<compile_context>
chip_gen: v5e
topology: v5e:2x2
jax: 0.10.0
libtpu: 0.0.40
codegen_flags: <defaults>
</compile_context>

<pallas_src>
import numpy as np
import jax
import jax.numpy as jnp
from jax.experimental import pallas as pl
from jax.experimental.pallas import tpu as pltpu

COMPUTE_DTYPE = jnp.bfloat16          # MXU dtype; gate/state math stays f32 (v5e-safe)
GX_SCRATCH_DTYPE = jnp.float32        # flip to bf16 on v7x for extra VMEM headroom
_VMEM_LIMIT = 48 * 1024 * 1024


def _round_up(x, m):
    return ((x + m - 1) // m) * m


def _sigmoid_eup(x):
    # EUP exp + approximate EUP reciprocal (avoids Newton-refined divide on v5e).
    return pl.reciprocal(1.0 + jnp.exp(-x), approx=True)


# ------------------------------ Pallas kernels ------------------------------

def matmul_bias_kernel(x_ref, w_ref, b_ref, o_ref):
    # [tm, K] @ [K, tn] + [1, tn] -> [tm, tn], f32 accumulate on the MXU.
    acc = jnp.dot(x_ref[...], w_ref[...], preferred_element_type=jnp.float32)
    o_ref[...] = (acc + b_ref[...]).astype(o_ref.dtype)


def matmul_bias(x, w, b, out_dtype=jnp.float32, tm_max=256, tn_max=512):
    """Tiled [M,K]@[K,N] + bias.  Callers pre-pad M/N so the pad branches are cold."""
    M, K = x.shape
    Kw, N = w.shape
    assert K == Kw and b.shape == (1, N)
    tm = tm_max if M >= tm_max else _round_up(M, 16)   # 16: bf16 sublane packing
    tn = tn_max if N >= tn_max else _round_up(N, 128)
    Mp, Np = _round_up(M, tm), _round_up(N, tn)
    if Mp != M:
        x = jnp.pad(x, ((0, Mp - M), (0, 0)))
    if Np != N:
        w = jnp.pad(w, ((0, 0), (0, Np - N)))
        b = jnp.pad(b, ((0, 0), (0, Np - N)))
    out = pl.pallas_call(
        matmul_bias_kernel,
        out_shape=jax.ShapeDtypeStruct((Mp, Np), out_dtype),
        grid_spec=pltpu.PrefetchScalarGridSpec(
            num_scalar_prefetch=0,
            grid=(Mp // tm, Np // tn),                  # M axis first (megacore)
            in_specs=[pl.BlockSpec((tm, K), lambda i, j: (i, 0)),
                      pl.BlockSpec((K, tn), lambda i, j: (0, j)),
                      pl.BlockSpec((1, tn), lambda i, j: (0, j))],
            out_specs=pl.BlockSpec((tm, tn), lambda i, j: (i, j)),
        ),
        compiler_params=pltpu.CompilerParams(
            dimension_semantics=("parallel", "parallel"),
            vmem_limit_bytes=_VMEM_LIMIT),
    )(x, w, b)
    if Mp != M or Np != N:
        out = out[:M, :N]
    return out


def lstm_layer_kernel(x_ref, wih_hbm, whh_hbm, b_ref, o_ref,
                      wih_sc, whh_sc, h_sc, c_sc, gx_sc, dma_sem):
    """Fused LSTM layer over one chunk of Tc timesteps.

    x_ref:   (Tc, Bp, Inp) bf16   layer input chunk (streamed via BlockSpec)
    wih_hbm: (Inp, 4Hp)    bf16   W_ih^T in HBM (pl.ANY)  -> copied once to wih_sc
    whh_hbm: (Hp, 4Hp)     bf16   W_hh^T in HBM (pl.ANY)  -> copied once to whh_sc
    b_ref:   (1, 4Hp)      f32    b_ih + b_hh
    o_ref:   (Tc, Bp, Hp)  bf16   hidden states for the chunk
    h_sc/c_sc: (Bp, Hp)    f32    recurrent state carried across grid steps
    gx_sc:   (Tc, Bp, 4Hp)        chunk gate pre-activations (VMEM only, no HBM)
    """
    Tc, Bp, Inp = x_ref.shape
    Hp = h_sc.shape[-1]
    G = 4 * Hp

    @pl.when(pl.program_id(0) == 0)
    def _():
        # Single-buffered weight residency: DMA HBM -> VMEM once for the layer.
        c1 = pltpu.make_async_copy(wih_hbm, wih_sc, dma_sem.at[0])
        c2 = pltpu.make_async_copy(whh_hbm, whh_sc, dma_sem.at[1])
        c1.start(); c2.start()
        c1.wait(); c2.wait()
        h_sc[...] = jnp.zeros_like(h_sc)
        c_sc[...] = jnp.zeros_like(c_sc)

    # Input projection for the whole chunk: ONE MXU matmul, result stays in VMEM.
    x2 = x_ref[...].reshape(Tc * Bp, Inp)
    gx = jnp.dot(x2, wih_sc[...], preferred_element_type=jnp.float32) + b_ref[...]
    gx_sc[...] = gx.reshape(Tc, Bp, G).astype(gx_sc.dtype)

    def step(tt, carry):
        h, c = carry                                       # f32 [Bp, Hp]
        # Stream W_hh^T from VMEM at the dot site (keeps vregs for h/c/gates).
        gates = gx_sc[tt].astype(jnp.float32) + jnp.dot(
            h.astype(whh_sc.dtype), whh_sc[...],
            preferred_element_type=jnp.float32)
        # gate slices are whole 128-lane vregs (Hp is a multiple of 128)
        i = _sigmoid_eup(gates[:, 0 * Hp:1 * Hp])
        f = _sigmoid_eup(gates[:, 1 * Hp:2 * Hp])
        g = jnp.tanh(gates[:, 2 * Hp:3 * Hp])
        o = _sigmoid_eup(gates[:, 3 * Hp:4 * Hp])
        c = f * c + i * g
        h = o * jnp.tanh(c)
        o_ref[tt] = h.astype(o_ref.dtype)
        return h, c

    h, c = jax.lax.fori_loop(0, Tc, step, (h_sc[...], c_sc[...]),
                             unroll=min(Tc, 8))            # bounded unroll
    h_sc[...] = h
    c_sc[...] = c


def run_lstm_layer(x_seq, wih_tp, whh_tp, bias_p, Hp, time_chunk):
    """x_seq: (Tp, Bp, Inp) bf16, time-major, Tp % time_chunk == 0."""
    Tp, Bp, Inp = x_seq.shape
    G = 4 * Hp
    Tc = time_chunk
    assert Tp % Tc == 0
    return pl.pallas_call(
        lstm_layer_kernel,
        out_shape=jax.ShapeDtypeStruct((Tp, Bp, Hp), COMPUTE_DTYPE),
        grid_spec=pltpu.PrefetchScalarGridSpec(
            num_scalar_prefetch=0,
            grid=(Tp // Tc,),
            in_specs=[pl.BlockSpec((Tc, Bp, Inp), lambda c: (c, 0, 0)),
                      pl.BlockSpec(memory_space=pl.ANY),    # W_ih^T stays in HBM
                      pl.BlockSpec(memory_space=pl.ANY),    # W_hh^T stays in HBM
                      pl.BlockSpec((1, G), lambda c: (0, 0))],
            out_specs=pl.BlockSpec((Tc, Bp, Hp), lambda c: (c, 0, 0)),
            scratch_shapes=[pltpu.VMEM((Inp, G), COMPUTE_DTYPE),    # W_ih^T (1 buf)
                            pltpu.VMEM((Hp, G), COMPUTE_DTYPE),     # W_hh^T (1 buf)
                            pltpu.VMEM((Bp, Hp), jnp.float32),      # h
                            pltpu.VMEM((Bp, Hp), jnp.float32),      # c
                            pltpu.VMEM((Tc, Bp, G), GX_SCRATCH_DTYPE),
                            pltpu.SemaphoreType.DMA((2,))],
        ),
        compiler_params=pltpu.CompilerParams(
            dimension_semantics=("arbitrary",),   # time carries state: serial
            vmem_limit_bytes=_VMEM_LIMIT),
    )(x_seq, wih_tp, whh_tp, bias_p)


# ----------------------------- Parameter setup ------------------------------

def xavier_normal(key, shape):
    fan_out, fan_in = shape
    std = (2.0 / (fan_in + fan_out)) ** 0.5
    return std * jax.random.normal(key, shape, dtype=jnp.float32)


def make_params(key, num_embeddings, embedding_dim, num_layers):
    V, E, H = num_embeddings, embedding_dim, embedding_dim
    keys = jax.random.split(key, 1 + 2 * num_layers)

    # nn.Embedding(V + 1, E, padding_idx=V); padding row zeroed in LSTM.__init__
    emb = xavier_normal(keys[0], (V + 1, E))
    emb = emb.at[-1].set(0.0)

    layers = []
    for l in range(num_layers):
        in_size = E if l == 0 else H
        w_ih = xavier_normal(keys[1 + 2 * l], (4 * H, in_size))
        w_hh = xavier_normal(keys[2 + 2 * l], (4 * H, H))
        b_ih = jnp.zeros((4 * H,), jnp.float32)   # init_params zeros biases
        b_hh = jnp.zeros((4 * H,), jnp.float32)
        layers.append((w_ih, w_hh, b_ih, b_hh))
    return emb, layers


def prepare_params(emb, layers, compute_dtype=COMPUTE_DTYPE):
    """One-time transpose + lane padding + bf16 cast of ALL weights (incl. tied head)."""
    V1, E = emb.shape
    V = V1 - 1
    H = E
    Ep, Hp = _round_up(E, 128), _round_up(H, 128)
    tn_out = 512 if V >= 512 else _round_up(V, 128)     # projection tile
    Vp = _round_up(V, tn_out)                           # pre-pad to tile multiple

    # bf16 lookup table, padded to Ep lanes (padding row stays zero).
    emb_bf = jnp.pad(emb, ((0, 0), (0, Ep - E))).astype(compute_dtype)

    def pad_gate_cols(m, rows_p):
        # m: [rows, 4H] (gate order i,f,g,o) -> [rows_p, 4*Hp], zero padded
        rows = m.shape[0]
        out = jnp.zeros((rows_p, 4 * Hp), m.dtype)
        for g in range(4):
            out = out.at[:rows, g * Hp:g * Hp + H].set(m[:, g * H:(g + 1) * H])
        return out

    prep_layers = []
    for (w_ih, w_hh, b_ih, b_hh) in layers:
        in_size = w_ih.shape[1]
        Inp = _round_up(in_size, 128)
        wih_tp = pad_gate_cols(w_ih.T, Inp).astype(compute_dtype)   # [Inp, 4Hp]
        whh_tp = pad_gate_cols(w_hh.T, Hp).astype(compute_dtype)    # [Hp, 4Hp]
        bias_p = pad_gate_cols((b_ih + b_hh)[None, :], 1)           # f32 [1, 4Hp]
        prep_layers.append((wih_tp, whh_tp, bias_p))

    # Tied output projection weight: Linear(E, V, bias=False), W = emb[:-1]
    w_out_tp = jnp.zeros((Ep, Vp), jnp.float32)
    w_out_tp = w_out_tp.at[:E, :V].set(emb[:-1].T).astype(compute_dtype)
    out_bias = jnp.zeros((1, Vp), jnp.float32)           # pre-padded zero bias

    dims = dict(E=E, H=H, V=V, Ep=Ep, Hp=Hp, Vp=Vp)
    return emb_bf, prep_layers, w_out_tp, out_bias, dims


# --------------------------------- Forward ----------------------------------

def lstm_model_forward(tokens, lengths, prepared, time_chunk=32):
    """tokens: [B, T] int32, lengths: host numpy array [B] (sorted descending).

    time_chunk guidance: 32-64 on v5e/v6e, 16-32 on v7x (64 MiB VMEM).
    """
    emb_bf, layers_p, w_out_tp, out_bias, dims = prepared
    Hp, Vp, V = dims["Hp"], dims["Vp"], dims["V"]
    B, T = tokens.shape
    lengths = np.asarray(lengths)
    assert lengths.shape[0] == B and np.all(np.diff(lengths) <= 0), \
        "lengths must be host-static and sorted descending (pack_padded_sequence)"

    Bp = _round_up(B, 16)               # 16 sublanes for bf16 activations
    Tc = min(time_chunk, T)
    Tp = _round_up(T, Tc)

    # Single bf16 gather straight into the padded time-major layout: pad the
    # (tiny) token grid with the padding index (its embedding row is zero).
    tok_tm = jnp.full((Tp, Bp), V, jnp.int32)
    tok_tm = tok_tm.at[:T, :B].set(tokens.T.astype(jnp.int32))
    h_seq = jnp.take(emb_bf, tok_tm, axis=0)               # bf16 [Tp, Bp, Ep]

    for (wih_tp, whh_tp, bias_p) in layers_p:
        # Fused layer: input projection + recurrence, gx never touches HBM.
        h_seq = run_lstm_layer(h_seq, wih_tp, whh_tp, bias_p, Hp, Tc)
        # TODO(synk): inter-layer dropout (drop_ratio) omitted — eval-mode identity.

    # pack_padded_sequence(batch_first=True).data ordering via ONE gather:
    # time-major; at step t include batch items with length > t (sorted desc).
    M = int(lengths.sum())
    idx = np.concatenate([t * Bp + np.arange(int(np.sum(lengths > t)))
                          for t in range(T) if int(np.sum(lengths > t)) > 0])
    # Pad the index array so the projection M is already a tile multiple
    # (no per-call activation pad inside matmul_bias).
    Mp_rows = _round_up(M, 256) if M >= 256 else _round_up(M, 16)
    idx_p = np.zeros((Mp_rows,), np.int32)
    idx_p[:M] = idx.astype(np.int32)
    packed = jnp.take(h_seq.reshape(Tp * Bp, Hp),
                      jnp.asarray(idx_p), axis=0)           # bf16 [Mp_rows, Hp]

    # Tied output projection (weight/bias pre-padded to lane-dense Vp columns).
    logits = matmul_bias(packed, w_out_tp, out_bias, out_dtype=jnp.float32)
    return logits[:M, :V]                                   # [sum(lengths), V]


# ------------------------------- Pure-JAX ref --------------------------------

def ref_forward(tokens, lengths, emb_weight, layers):
    x = jnp.take(emb_weight, tokens, axis=0)               # [B, T, E]
    x = jnp.transpose(x, (1, 0, 2))                        # [T, B, E]
    for (w_ih, w_hh, b_ih, b_hh) in layers:
        T, B, _ = x.shape
        H = w_hh.shape[1]
        hh = jnp.zeros((B, H)); cc = jnp.zeros((B, H))
        outs = []
        for t in range(T):
            gates = x[t] @ w_ih.T + b_ih + hh @ w_hh.T + b_hh
            i, f, g, o = jnp.split(gates, 4, axis=-1)
            cc = jax.nn.sigmoid(f) * cc + jax.nn.sigmoid(i) * jnp.tanh(g)
            hh = jax.nn.sigmoid(o) * jnp.tanh(cc)
            outs.append(hh)
        x = jnp.stack(outs)
    lengths = np.asarray(lengths)
    rows = []
    for t in range(x.shape[0]):
        bs_t = int(np.sum(lengths > t))
        if bs_t > 0:
            rows.append(x[t, :bs_t])
    packed = jnp.concatenate(rows, axis=0)
    return packed @ emb_weight[:-1].T


# ----------------------------------- Main ------------------------------------

if __name__ == "__main__":
    V = 32            # num_embeddings
    E = 32            # embedding_dim (== hidden size)
    NUM_LAYERS = 2
    B, T = 2, 8
    lengths = np.array([8, 5], dtype=np.int64)   # sorted descending (packed seq)

    key = jax.random.PRNGKey(0)
    k_tok, k_param = jax.random.split(key)

    tokens = jax.random.randint(k_tok, (B, T), 0, V, dtype=jnp.int32)
    # Fill positions beyond each length with the padding index V.
    t_idx = jnp.arange(T)[None, :]
    tokens = jnp.where(t_idx < jnp.asarray(lengths)[:, None], tokens, V)

    emb_weight, layers = make_params(k_param, V, E, NUM_LAYERS)
    prepared = prepare_params(emb_weight, layers)   # transpose/pad/cast ONCE

    # time_chunk=4 -> 2 grid steps, exercises cross-chunk state carry.
    out = lstm_model_forward(tokens, lengths, prepared, time_chunk=4)
    out = jax.block_until_ready(out)

    ref = ref_forward(tokens, lengths, emb_weight, layers)
    assert out.shape == (int(lengths.sum()), V), out.shape
    # bf16 MXU dots + approx-EUP sigmoid vs f32 reference -> loose tolerance.
    np.testing.assert_allclose(np.asarray(out), np.asarray(ref),
                               rtol=2e-2, atol=2e-2)
    print("KERNEL_OK")
</pallas_src>

<mosaic_0001>
module attributes {stable_mosaic.version = 11 : i64} {
  func.func @lstm_layer_kernel(%arg0: i32, %arg1: memref<4x16x128xbf16, #tpu.memory_space<vmem>>, %arg2: memref<128x512xbf16, #tpu.memory_space<any>>, %arg3: memref<128x512xbf16, #tpu.memory_space<any>>, %arg4: memref<1x512xf32, #tpu.memory_space<vmem>>, %arg5: memref<4x16x128xbf16, #tpu.memory_space<vmem>>, %arg6: memref<128x512xbf16, #tpu.memory_space<vmem>>, %arg7: memref<128x512xbf16, #tpu.memory_space<vmem>>, %arg8: memref<16x128xf32, #tpu.memory_space<vmem>>, %arg9: memref<16x128xf32, #tpu.memory_space<vmem>>, %arg10: memref<4x16x512xf32, #tpu.memory_space<vmem>>, %arg11: memref<2x!tpu.dma_semaphore, #tpu.memory_space<semaphore_mem>>) attributes {dimension_semantics = [#tpu.dimension_semantics<arbitrary>], iteration_bounds = array<i64: 2>, scalar_prefetch = 0 : i64, scratch_operands = 6 : i64, tpu.core_type = #tpu.core_type<tc>, window_params = [{transform_indices = @transform_0, window_bounds = array<i64: 4, 16, 128>}, {}, {}, {pipeline_mode = #tpu.pipeline_mode<synchronous>, transform_indices = @transform_3, window_bounds = array<i64: 1, 512>}, {transform_indices = @transform_4, window_bounds = array<i64: 4, 16, 128>}]} {
    %c0_i32 = arith.constant 0 : i32
    %0 = arith.cmpi eq, %arg0, %c0_i32 : i32
    %1 = arith.extui %0 : i1 to i32
    %c0_i32_0 = arith.constant 0 : i32
    %2 = arith.cmpi ne, %1, %c0_i32_0 : i32
    scf.if %2 {
      %c0_i32_71 = arith.constant 0 : i32
      %176 = tpu.memref_slice %arg11[%c0_i32_71] : memref<2x!tpu.dma_semaphore, #tpu.memory_space<semaphore_mem>> -> memref<1x!tpu.dma_semaphore, #tpu.memory_space<semaphore_mem>>
      %177 = tpu.memref_squeeze %176 : memref<1x!tpu.dma_semaphore, #tpu.memory_space<semaphore_mem>> -> memref<!tpu.dma_semaphore, #tpu.memory_space<semaphore_mem>>
      tpu.enqueue_dma source(%arg2 : memref<128x512xbf16, #tpu.memory_space<any>>) target(%arg6 : memref<128x512xbf16, #tpu.memory_space<vmem>>) target_semaphore(%177 : memref<!tpu.dma_semaphore, #tpu.memory_space<semaphore_mem>>)
      %c1_i32_72 = arith.constant 1 : i32
      %178 = tpu.memref_slice %arg11[%c1_i32_72] : memref<2x!tpu.dma_semaphore, #tpu.memory_space<semaphore_mem>> -> memref<1x!tpu.dma_semaphore, #tpu.memory_space<semaphore_mem>>
      %179 = tpu.memref_squeeze %178 : memref<1x!tpu.dma_semaphore, #tpu.memory_space<semaphore_mem>> -> memref<!tpu.dma_semaphore, #tpu.memory_space<semaphore_mem>>
      tpu.enqueue_dma source(%arg3 : memref<128x512xbf16, #tpu.memory_space<any>>) target(%arg7 : memref<128x512xbf16, #tpu.memory_space<vmem>>) target_semaphore(%179 : memref<!tpu.dma_semaphore, #tpu.memory_space<semaphore_mem>>)
      %c0_i32_73 = arith.constant 0 : i32
      %180 = tpu.memref_slice %arg11[%c0_i32_73] : memref<2x!tpu.dma_semaphore, #tpu.memory_space<semaphore_mem>> -> memref<1x!tpu.dma_semaphore, #tpu.memory_space<semaphore_mem>>
      %181 = tpu.memref_squeeze %180 : memref<1x!tpu.dma_semaphore, #tpu.memory_space<semaphore_mem>> -> memref<!tpu.dma_semaphore, #tpu.memory_space<semaphore_mem>>
      tpu.wait_dma2 semaphore(%181 : memref<!tpu.dma_semaphore, #tpu.memory_space<semaphore_mem>>) src(%arg2 : memref<128x512xbf16, #tpu.memory_space<any>>) dst(%arg6 : memref<128x512xbf16, #tpu.memory_space<vmem>>)
      %c1_i32_74 = arith.constant 1 : i32
      %182 = tpu.memref_slice %arg11[%c1_i32_74] : memref<2x!tpu.dma_semaphore, #tpu.memory_space<semaphore_mem>> -> memref<1x!tpu.dma_semaphore, #tpu.memory_space<semaphore_mem>>
      %183 = tpu.memref_squeeze %182 : memref<1x!tpu.dma_semaphore, #tpu.memory_space<semaphore_mem>> -> memref<!tpu.dma_semaphore, #tpu.memory_space<semaphore_mem>>
      tpu.wait_dma2 semaphore(%183 : memref<!tpu.dma_semaphore, #tpu.memory_space<semaphore_mem>>) src(%arg3 : memref<128x512xbf16, #tpu.memory_space<any>>) dst(%arg7 : memref<128x512xbf16, #tpu.memory_space<vmem>>)
      %cst_75 = arith.constant 0.000000e+00 : f32
      %184 = vector.broadcast %cst_75 : f32 to vector<16x128xf32>
      %c0_76 = arith.constant 0 : index
      %c0_77 = arith.constant 0 : index
      %185 = vector.load %arg8[%c0_76, %c0_77] : memref<16x128xf32, #tpu.memory_space<vmem>>, vector<16x128xf32>
      tpu.vector_store %arg8[%c0_76, %c0_77], %184 {strides = array<i32>} : memref<16x128xf32, #tpu.memory_space<vmem>>, vector<16x128xf32>,
      %cst_78 = arith.constant 0.000000e+00 : f32
      %186 = vector.broadcast %cst_78 : f32 to vector<16x128xf32>
      %c0_79 = arith.constant 0 : index
      %c0_80 = arith.constant 0 : index
      %187 = vector.load %arg9[%c0_79, %c0_80] : memref<16x128xf32, #tpu.memory_space<vmem>>, vector<16x128xf32>
      tpu.vector_store %arg9[%c0_79, %c0_80], %186 {strides = array<i32>} : memref<16x128xf32, #tpu.memory_space<vmem>>, vector<16x128xf32>,
    } else {
    }
    %c0 = arith.constant 0 : index
    %c0_1 = arith.constant 0 : index
    %c0_2 = arith.constant 0 : index
    %3 = vector.load %arg1[%c0, %c0_1, %c0_2] : memref<4x16x128xbf16, #tpu.memory_space<vmem>>, vector<4x16x128xbf16>
    %4 = vector.shape_cast %3 : vector<4x16x128xbf16> to vector<64x128xbf16>
    %c0_3 = arith.constant 0 : index
    %c0_4 = arith.constant 0 : index
    %5 = vector.load %arg6[%c0_3, %c0_4] : memref<128x512xbf16, #tpu.memory_space<vmem>>, vector<128x512xbf16>
    %cst = arith.constant dense<0.000000e+00> : vector<64x512xf32>
    %6 = tpu.matmul %4, %5, %cst {dimension_numbers = #tpu.dot_dimension_numbers<[1], [0], [0], [1], [0, 0, 1, 1], [], []>} : vector<64x128xbf16>, vector<128x512xbf16>, vector<64x512xf32> -> vector<64x512xf32>
    %c0_5 = arith.constant 0 : index
    %c0_6 = arith.constant 0 : index
    %7 = vector.load %arg4[%c0_5, %c0_6] : memref<1x512xf32, #tpu.memory_space<vmem>>, vector<1x512xf32>
    %8 = vector.broadcast %7 : vector<1x512xf32> to vector<64x512xf32>
    %9 = arith.addf %6, %8 : vector<64x512xf32>
    %10 = vector.shape_cast %9 : vector<64x512xf32> to vector<4x16x512xf32>
    %c0_7 = arith.constant 0 : index
    %c0_8 = arith.constant 0 : index
    %c0_9 = arith.constant 0 : index
    %11 = vector.load %arg10[%c0_7, %c0_8, %c0_9] : memref<4x16x512xf32, #tpu.memory_space<vmem>>, vector<4x16x512xf32>
    tpu.vector_store %arg10[%c0_7, %c0_8, %c0_9], %10 {strides = array<i32>} : memref<4x16x512xf32, #tpu.memory_space<vmem>>, vector<4x16x512xf32>,
    %c0_10 = arith.constant 0 : index
    %c0_11 = arith.constant 0 : index
    %12 = vector.load %arg8[%c0_10, %c0_11] : memref<16x128xf32, #tpu.memory_space<vmem>>, vector<16x128xf32>
    %c0_12 = arith.constant 0 : index
    %c0_13 = arith.constant 0 : index
    %13 = vector.load %arg9[%c0_12, %c0_13] : memref<16x128xf32, #tpu.memory_space<vmem>>, vector<16x128xf32>
    %c0_i32_14 = arith.constant 0 : i32
    %14 = arith.index_cast %c0_i32_14 : i32 to index
    %c0_15 = arith.constant 0 : index
    %c0_16 = arith.constant 0 : index
    %15 = vector.load %arg10[%14, %c0_15, %c0_16] : memref<4x16x512xf32, #tpu.memory_space<vmem>>, vector<1x16x512xf32>
    %16 = vector.shape_cast %15 : vector<1x16x512xf32> to vector<16x512xf32>
    %17 = arith.truncf %12 : vector<16x128xf32> to vector<16x128xbf16>
    %c0_17 = arith.constant 0 : index
    %c0_18 = arith.constant 0 : index
    %18 = vector.load %arg7[%c0_17, %c0_18] : memref<128x512xbf16, #tpu.memory_space<vmem>>, vector<128x512xbf16>
    %cst_19 = arith.constant dense<0.000000e+00> : vector<16x512xf32>
    %19 = tpu.matmul %17, %18, %cst_19 {dimension_numbers = #tpu.dot_dimension_numbers<[1], [0], [0], [1], [0, 0, 1, 1], [], []>} : vector<16x128xbf16>, vector<128x512xbf16>, vector<16x512xf32> -> vector<16x512xf32>
    %20 = arith.addf %16, %19 : vector<16x512xf32>
    %21 = vector.extract_strided_slice %20 {offsets = [0, 0], sizes = [16, 128], strides = [1, 1]} : vector<16x512xf32> to vector<16x128xf32>
    %cst_20 = arith.constant 0.000000e+00 : f32
    %22 = vector.broadcast %cst_20 : f32 to vector<16x128xf32>
    %23 = arith.subf %22, %21 : vector<16x128xf32>
    %24 = math.exp %23 : vector<16x128xf32>
    %cst_21 = arith.constant 1.000000e+00 : f32
    %25 = vector.broadcast %cst_21 : f32 to vector<16x128xf32>
    %26 = arith.addf %25, %24 : vector<16x128xf32>
    %27 = tpu.reciprocal %26 {approx = true} : vector<16x128xf32> -> vector<16x128xf32>
    %28 = vector.extract_strided_slice %20 {offsets = [0, 128], sizes = [16, 128], strides = [1, 1]} : vector<16x512xf32> to vector<16x128xf32>
    %cst_22 = arith.constant 0.000000e+00 : f32
    %29 = vector.broadcast %cst_22 : f32 to vector<16x128xf32>
    %30 = arith.subf %29, %28 : vector<16x128xf32>
    %31 = math.exp %30 : vector<16x128xf32>
    %cst_23 = arith.constant 1.000000e+00 : f32
    %32 = vector.broadcast %cst_23 : f32 to vector<16x128xf32>
    %33 = arith.addf %32, %31 : vector<16x128xf32>
    %34 = tpu.reciprocal %33 {approx = true} : vector<16x128xf32> -> vector<16x128xf32>
    %35 = vector.extract_strided_slice %20 {offsets = [0, 256], sizes = [16, 128], strides = [1, 1]} : vector<16x512xf32> to vector<16x128xf32>
    %36 = math.tanh %35 : vector<16x128xf32>
    %37 = vector.extract_strided_slice %20 {offsets = [0, 384], sizes = [16, 128], strides = [1, 1]} : vector<16x512xf32> to vector<16x128xf32>
    %cst_24 = arith.constant 0.000000e+00 : f32
    %38 = vector.broadcast %cst_24 : f32 to vector<16x128xf32>
    %39 = arith.subf %38, %37 : vector<16x128xf32>
    %40 = math.exp %39 : vector<16x128xf32>
    %cst_25 = arith.constant 1.000000e+00 : f32
    %41 = vector.broadcast %cst_25 : f32 to vector<16x128xf32>
    %42 = arith.addf %41, %40 : vector<16x128xf32>
    %43 = tpu.reciprocal %42 {approx = true} : vector<16x128xf32> -> vector<16x128xf32>
    %44 = arith.mulf %34, %13 : vector<16x128xf32>
    %45 = arith.mulf %27, %36 : vector<16x128xf32>
    %46 = arith.addf %44, %45 : vector<16x128xf32>
    %47 = math.tanh %46 : vector<16x128xf32>
    %48 = arith.mulf %43, %47 : vector<16x128xf32>
    %49 = arith.truncf %48 : vector<16x128xf32> to vector<16x128xbf16>
    %50 = arith.index_cast %c0_i32_14 : i32 to index
    %c0_26 = arith.constant 0 : index
    %c0_27 = arith.constant 0 : index
    %51 = vector.load %arg5[%50, %c0_26, %c0_27] : memref<4x16x128xbf16, #tpu.memory_space<vmem>>, vector<1x16x128xbf16>
    %52 = vector.shape_cast %51 : vector<1x16x128xbf16> to vector<16x128xbf16>
    %53 = vector.shape_cast %49 : vector<16x128xbf16> to vector<1x16x128xbf16>
    tpu.vector_store %arg5[%50, %c0_26, %c0_27], %53 {strides = array<i32>} : memref<4x16x128xbf16, #tpu.memory_space<vmem>>, vector<1x16x128xbf16>,
    %c1_i32 = arith.constant 1 : i32
    %54 = arith.index_cast %c1_i32 : i32 to index
    %c0_28 = arith.constant 0 : index
    %c0_29 = arith.constant 0 : index
    %55 = vector.load %arg10[%54, %c0_28, %c0_29] : memref<4x16x512xf32, #tpu.memory_space<vmem>>, vector<1x16x512xf32>
    %56 = vector.shape_cast %55 : vector<1x16x512xf32> to vector<16x512xf32>
    %57 = arith.truncf %48 : vector<16x128xf32> to vector<16x128xbf16>
    %c0_30 = arith.constant 0 : index
    %c0_31 = arith.constant 0 : index
    %58 = vector.load %arg7[%c0_30, %c0_31] : memref<128x512xbf16, #tpu.memory_space<vmem>>, vector<128x512xbf16>
    %cst_32 = arith.constant dense<0.000000e+00> : vector<16x512xf32>
    %59 = tpu.matmul %57, %58, %cst_32 {dimension_numbers = #tpu.dot_dimension_numbers<[1], [0], [0], [1], [0, 0, 1, 1], [], []>} : vector<16x128xbf16>, vector<128x512xbf16>, vector<16x512xf32> -> vector<16x512xf32>
    %60 = arith.addf %56, %59 : vector<16x512xf32>
    %61 = vector.extract_strided_slice %60 {offsets = [0, 0], sizes = [16, 128], strides = [1, 1]} : vector<16x512xf32> to vector<16x128xf32>
    %cst_33 = arith.constant 0.000000e+00 : f32
    %62 = vector.broadcast %cst_33 : f32 to vector<16x128xf32>
    %63 = arith.subf %62, %61 : vector<16x128xf32>
    %64 = math.exp %63 : vector<16x128xf32>
    %cst_34 = arith.constant 1.000000e+00 : f32
    %65 = vector.broadcast %cst_34 : f32 to vector<16x128xf32>
    %66 = arith.addf %65, %64 : vector<16x128xf32>
    %67 = tpu.reciprocal %66 {approx = true} : vector<16x128xf32> -> vector<16x128xf32>
    %68 = vector.extract_strided_slice %60 {offsets = [0, 128], sizes = [16, 128], strides = [1, 1]} : vector<16x512xf32> to vector<16x128xf32>
    %cst_35 = arith.constant 0.000000e+00 : f32
    %69 = vector.broadcast %cst_35 : f32 to vector<16x128xf32>
    %70 = arith.subf %69, %68 : vector<16x128xf32>
    %71 = math.exp %70 : vector<16x128xf32>
    %cst_36 = arith.constant 1.000000e+00 : f32
    %72 = vector.broadcast %cst_36 : f32 to vector<16x128xf32>
    %73 = arith.addf %72, %71 : vector<16x128xf32>
    %74 = tpu.reciprocal %73 {approx = true} : vector<16x128xf32> -> vector<16x128xf32>
    %75 = vector.extract_strided_slice %60 {offsets = [0, 256], sizes = [16, 128], strides = [1, 1]} : vector<16x512xf32> to vector<16x128xf32>
    %76 = math.tanh %75 : vector<16x128xf32>
    %77 = vector.extract_strided_slice %60 {offsets = [0, 384], sizes = [16, 128], strides = [1, 1]} : vector<16x512xf32> to vector<16x128xf32>
    %cst_37 = arith.constant 0.000000e+00 : f32
    %78 = vector.broadcast %cst_37 : f32 to vector<16x128xf32>
    %79 = arith.subf %78, %77 : vector<16x128xf32>
    %80 = math.exp %79 : vector<16x128xf32>
    %cst_38 = arith.constant 1.000000e+00 : f32
    %81 = vector.broadcast %cst_38 : f32 to vector<16x128xf32>
    %82 = arith.addf %81, %80 : vector<16x128xf32>
    %83 = tpu.reciprocal %82 {approx = true} : vector<16x128xf32> -> vector<16x128xf32>
    %84 = arith.mulf %74, %46 : vector<16x128xf32>
    %85 = arith.mulf %67, %76 : vector<16x128xf32>
    %86 = arith.addf %84, %85 : vector<16x128xf32>
    %87 = math.tanh %86 : vector<16x128xf32>
    %88 = arith.mulf %83, %87 : vector<16x128xf32>
    %89 = arith.truncf %88 : vector<16x128xf32> to vector<16x128xbf16>
    %90 = arith.index_cast %c1_i32 : i32 to index
    %c0_39 = arith.constant 0 : index
    %c0_40 = arith.constant 0 : index
    %91 = vector.load %arg5[%90, %c0_39, %c0_40] : memref<4x16x128xbf16, #tpu.memory_space<vmem>>, vector<1x16x128xbf16>
    %92 = vector.shape_cast %91 : vector<1x16x128xbf16> to vector<16x128xbf16>
    %93 = vector.shape_cast %89 : vector<16x128xbf16> to vector<1x16x128xbf16>
    tpu.vector_store %arg5[%90, %c0_39, %c0_40], %93 {strides = array<i32>} : memref<4x16x128xbf16, #tpu.memory_space<vmem>>, vector<1x16x128xbf16>,
    %c2_i32 = arith.constant 2 : i32
    %94 = arith.index_cast %c2_i32 : i32 to index
    %c0_41 = arith.constant 0 : index
    %c0_42 = arith.constant 0 : index
    %95 = vector.load %arg10[%94, %c0_41, %c0_42] : memref<4x16x512xf32, #tpu.memory_space<vmem>>, vector<1x16x512xf32>
    %96 = vector.shape_cast %95 : vector<1x16x512xf32> to vector<16x512xf32>
    %97 = arith.truncf %88 : vector<16x128xf32> to vector<16x128xbf16>
    %c0_43 = arith.constant 0 : index
    %c0_44 = arith.constant 0 : index
    %98 = vector.load %arg7[%c0_43, %c0_44] : memref<128x512xbf16, #tpu.memory_space<vmem>>, vector<128x512xbf16>
    %cst_45 = arith.constant dense<0.000000e+00> : vector<16x512xf32>
    %99 = tpu.matmul %97, %98, %cst_45 {dimension_numbers = #tpu.dot_dimension_numbers<[1], [0], [0], [1], [0, 0, 1, 1], [], []>} : vector<16x128xbf16>, vector<128x512xbf16>, vector<16x512xf32> -> vector<16x512xf32>
    %100 = arith.addf %96, %99 : vector<16x512xf32>
    %101 = vector.extract_strided_slice %100 {offsets = [0, 0], sizes = [16, 128], strides = [1, 1]} : vector<16x512xf32> to vector<16x128xf32>
    %cst_46 = arith.constant 0.000000e+00 : f32
    %102 = vector.broadcast %cst_46 : f32 to vector<16x128xf32>
    %103 = arith.subf %102, %101 : vector<16x128xf32>
    %104 = math.exp %103 : vector<16x128xf32>
    %cst_47 = arith.constant 1.000000e+00 : f32
    %105 = vector.broadcast %cst_47 : f32 to vector<16x128xf32>
    %106 = arith.addf %105, %104 : vector<16x128xf32>
    %107 = tpu.reciprocal %106 {approx = true} : vector<16x128xf32> -> vector<16x128xf32>
    %108 = vector.extract_strided_slice %100 {offsets = [0, 128], sizes = [16, 128], strides = [1, 1]} : vector<16x512xf32> to vector<16x128xf32>
    %cst_48 = arith.constant 0.000000e+00 : f32
    %109 = vector.broadcast %cst_48 : f32 to vector<16x128xf32>
    %110 = arith.subf %109, %108 : vector<16x128xf32>
    %111 = math.exp %110 : vector<16x128xf32>
    %cst_49 = arith.constant 1.000000e+00 : f32
    %112 = vector.broadcast %cst_49 : f32 to vector<16x128xf32>
    %113 = arith.addf %112, %111 : vector<16x128xf32>
    %114 = tpu.reciprocal %113 {approx = true} : vector<16x128xf32> -> vector<16x128xf32>
    %115 = vector.extract_strided_slice %100 {offsets = [0, 256], sizes = [16, 128], strides = [1, 1]} : vector<16x512xf32> to vector<16x128xf32>
    %116 = math.tanh %115 : vector<16x128xf32>
    %117 = vector.extract_strided_slice %100 {offsets = [0, 384], sizes = [16, 128], strides = [1, 1]} : vector<16x512xf32> to vector<16x128xf32>
    %cst_50 = arith.constant 0.000000e+00 : f32
    %118 = vector.broadcast %cst_50 : f32 to vector<16x128xf32>
    %119 = arith.subf %118, %117 : vector<16x128xf32>
    %120 = math.exp %119 : vector<16x128xf32>
    %cst_51 = arith.constant 1.000000e+00 : f32
    %121 = vector.broadcast %cst_51 : f32 to vector<16x128xf32>
    %122 = arith.addf %121, %120 : vector<16x128xf32>
    %123 = tpu.reciprocal %122 {approx = true} : vector<16x128xf32> -> vector<16x128xf32>
    %124 = arith.mulf %114, %86 : vector<16x128xf32>
    %125 = arith.mulf %107, %116 : vector<16x128xf32>
    %126 = arith.addf %124, %125 : vector<16x128xf32>
    %127 = math.tanh %126 : vector<16x128xf32>
    %128 = arith.mulf %123, %127 : vector<16x128xf32>
    %129 = arith.truncf %128 : vector<16x128xf32> to vector<16x128xbf16>
    %130 = arith.index_cast %c2_i32 : i32 to index
    %c0_52 = arith.constant 0 : index
    %c0_53 = arith.constant 0 : index
    %131 = vector.load %arg5[%130, %c0_52, %c0_53] : memref<4x16x128xbf16, #tpu.memory_space<vmem>>, vector<1x16x128xbf16>
    %132 = vector.shape_cast %131 : vector<1x16x128xbf16> to vector<16x128xbf16>
    %133 = vector.shape_cast %129 : vector<16x128xbf16> to vector<1x16x128xbf16>
    tpu.vector_store %arg5[%130, %c0_52, %c0_53], %133 {strides = array<i32>} : memref<4x16x128xbf16, #tpu.memory_space<vmem>>, vector<1x16x128xbf16>,
    %c3_i32 = arith.constant 3 : i32
    %134 = arith.index_cast %c3_i32 : i32 to index
    %c0_54 = arith.constant 0 : index
    %c0_55 = arith.constant 0 : index
    %135 = vector.load %arg10[%134, %c0_54, %c0_55] : memref<4x16x512xf32, #tpu.memory_space<vmem>>, vector<1x16x512xf32>
    %136 = vector.shape_cast %135 : vector<1x16x512xf32> to vector<16x512xf32>
    %137 = arith.truncf %128 : vector<16x128xf32> to vector<16x128xbf16>
    %c0_56 = arith.constant 0 : index
    %c0_57 = arith.constant 0 : index
    %138 = vector.load %arg7[%c0_56, %c0_57] : memref<128x512xbf16, #tpu.memory_space<vmem>>, vector<128x512xbf16>
    %cst_58 = arith.constant dense<0.000000e+00> : vector<16x512xf32>
    %139 = tpu.matmul %137, %138, %cst_58 {dimension_numbers = #tpu.dot_dimension_numbers<[1], [0], [0], [1], [0, 0, 1, 1], [], []>} : vector<16x128xbf16>, vector<128x512xbf16>, vector<16x512xf32> -> vector<16x512xf32>
    %140 = arith.addf %136, %139 : vector<16x512xf32>
    %141 = vector.extract_strided_slice %140 {offsets = [0, 0], sizes = [16, 128], strides = [1, 1]} : vector<16x512xf32> to vector<16x128xf32>
    %cst_59 = arith.constant 0.000000e+00 : f32
    %142 = vector.broadcast %cst_59 : f32 to vector<16x128xf32>
    %143 = arith.subf %142, %141 : vector<16x128xf32>
    %144 = math.exp %143 : vector<16x128xf32>
    %cst_60 = arith.constant 1.000000e+00 : f32
    %145 = vector.broadcast %cst_60 : f32 to vector<16x128xf32>
    %146 = arith.addf %145, %144 : vector<16x128xf32>
    %147 = tpu.reciprocal %146 {approx = true} : vector<16x128xf32> -> vector<16x128xf32>
    %148 = vector.extract_strided_slice %140 {offsets = [0, 128], sizes = [16, 128], strides = [1, 1]} : vector<16x512xf32> to vector<16x128xf32>
    %cst_61 = arith.constant 0.000000e+00 : f32
    %149 = vector.broadcast %cst_61 : f32 to vector<16x128xf32>
    %150 = arith.subf %149, %148 : vector<16x128xf32>
    %151 = math.exp %150 : vector<16x128xf32>
    %cst_62 = arith.constant 1.000000e+00 : f32
    %152 = vector.broadcast %cst_62 : f32 to vector<16x128xf32>
    %153 = arith.addf %152, %151 : vector<16x128xf32>
    %154 = tpu.reciprocal %153 {approx = true} : vector<16x128xf32> -> vector<16x128xf32>
    %155 = vector.extract_strided_slice %140 {offsets = [0, 256], sizes = [16, 128], strides = [1, 1]} : vector<16x512xf32> to vector<16x128xf32>
    %156 = math.tanh %155 : vector<16x128xf32>
    %157 = vector.extract_strided_slice %140 {offsets = [0, 384], sizes = [16, 128], strides = [1, 1]} : vector<16x512xf32> to vector<16x128xf32>
    %cst_63 = arith.constant 0.000000e+00 : f32
    %158 = vector.broadcast %cst_63 : f32 to vector<16x128xf32>
    %159 = arith.subf %158, %157 : vector<16x128xf32>
    %160 = math.exp %159 : vector<16x128xf32>
    %cst_64 = arith.constant 1.000000e+00 : f32
    %161 = vector.broadcast %cst_64 : f32 to vector<16x128xf32>
    %162 = arith.addf %161, %160 : vector<16x128xf32>
    %163 = tpu.reciprocal %162 {approx = true} : vector<16x128xf32> -> vector<16x128xf32>
    %164 = arith.mulf %154, %126 : vector<16x128xf32>
    %165 = arith.mulf %147, %156 : vector<16x128xf32>
    %166 = arith.addf %164, %165 : vector<16x128xf32>
    %167 = math.tanh %166 : vector<16x128xf32>
    %168 = arith.mulf %163, %167 : vector<16x128xf32>
    %169 = arith.truncf %168 : vector<16x128xf32> to vector<16x128xbf16>
    %170 = arith.index_cast %c3_i32 : i32 to index
    %c0_65 = arith.constant 0 : index
    %c0_66 = arith.constant 0 : index
    %171 = vector.load %arg5[%170, %c0_65, %c0_66] : memref<4x16x128xbf16, #tpu.memory_space<vmem>>, vector<1x16x128xbf16>
    %172 = vector.shape_cast %171 : vector<1x16x128xbf16> to vector<16x128xbf16>
    %173 = vector.shape_cast %169 : vector<16x128xbf16> to vector<1x16x128xbf16>
    tpu.vector_store %arg5[%170, %c0_65, %c0_66], %173 {strides = array<i32>} : memref<4x16x128xbf16, #tpu.memory_space<vmem>>, vector<1x16x128xbf16>,
    %c4_i32 = arith.constant 4 : i32
    %c0_67 = arith.constant 0 : index
    %c0_68 = arith.constant 0 : index
    %174 = vector.load %arg8[%c0_67, %c0_68] : memref<16x128xf32, #tpu.memory_space<vmem>>, vector<16x128xf32>
    tpu.vector_store %arg8[%c0_67, %c0_68], %168 {strides = array<i32>} : memref<16x128xf32, #tpu.memory_space<vmem>>, vector<16x128xf32>,
    %c0_69 = arith.constant 0 : index
    %c0_70 = arith.constant 0 : index
    %175 = vector.load %arg9[%c0_69, %c0_70] : memref<16x128xf32, #tpu.memory_space<vmem>>, vector<16x128xf32>
    tpu.vector_store %arg9[%c0_69, %c0_70], %166 {strides = array<i32>} : memref<16x128xf32, #tpu.memory_space<vmem>>, vector<16x128xf32>,
    return
  }
  func.func @transform_0(%arg0: i32) -> (i32, i32, i32) {
    %c0_i32 = arith.constant 0 : i32
    %c0_i32_0 = arith.constant 0 : i32
    %c0_i32_1 = arith.constant 0 : i32
    return %arg0, %c0_i32, %c0_i32_0 : i32, i32, i32
  }
  func.func @transform_3(%arg0: i32) -> (i32, i32) {
    %c0_i32 = arith.constant 0 : i32
    %c0_i32_0 = arith.constant 0 : i32
    %c0_i32_1 = arith.constant 0 : i32
    return %c0_i32, %c0_i32_0 : i32, i32
  }
  func.func @transform_4(%arg0: i32) -> (i32, i32, i32) {
    %c0_i32 = arith.constant 0 : i32
    %c0_i32_0 = arith.constant 0 : i32
    %c0_i32_1 = arith.constant 0 : i32
    return %arg0, %c0_i32, %c0_i32_0 : i32, i32, i32
  }
}

</mosaic_0001>

<bundles_post_ra>
// kernel: tpu_custom_call.1
= control target key start
LH: loop header
LB: loop body
LE: loop exit
PB: predicated region body
PF: predicated region fallthrough
CT: control target
= control target key end

     0   :  { %s3600_s0 = inlined_call_operand.hbm [shape: bf16[8,16,128], index: 0, kind: input, shape index: {}]   ;;  %s3601_s1 = inlined_call_operand.hbm [shape: bf16[128,512], index: 1, kind: input, shape index: {}]   ;;  %s3602_s2 = inlined_call_operand.hbm [shape: bf16[128,512], index: 2, kind: input, shape index: {}]   ;;  %s3603_s3 = inlined_call_operand.hbm [shape: f32[1,512], index: 3, kind: input, shape index: {}]   ;;  %s3604_s4 = inlined_call_operand.hbm [shape: bf16[8,16,128], index: 4, kind: output, shape index: {}]  }
   0x1   :  { %3605 = sst [smem:[#allocation25_spill]] %s3603_s3 }
   0x2   :  { %9 = vsyncpa [#allocation9], 0 }
   0x3   :  { %11 = vsyncpa [#allocation9 + $0x1], 0 }
   0x4   :  { %12 = vsyncpa [#allocation12], 0 }
   0x5   :  { %13 = vsyncpa [#allocation10], 0 }
   0x6   :  { %15 = vsyncpa [#allocation10 + $0x1], 0  ;;  %s3276_s15 = smov 0   ;;  %s3278_s16 = smov 0  }
   0x7   :  { %s3280_s17 = smov 0   ;;  %s3282_s18 = smov 0  }
   0x8 LB: > { %s3297_s19 = sadd.s32 4294967295, %s3241_s18   ;;  %s1993_s20 = sadd.s32 4294967294, %s3241_s18   ;;  %s3241_s18 = sphi %s3282_s18, %s3618_s18   ;;  %s3237_s17 = sphi %s3280_s17, %s3617_s17   ;;  %s3233_s16 = sphi %s3278_s16, %s3616_s16   ;;  %s3229_s15 = sphi %s3276_s15, %s3615_s15  }
   0x9   : > { %s3301_s21 = sadd.s32 1, %s3241_s18   ;;  %s28_s22 = sadd.s32 1, %s3237_s17 }
   0xa   : > { %s25_s23 = ssub.s32 %s3241_s18, %s3301_s21  ;;  %p35_p0 = scmp.ne.s32.totalorder %s3237_s17, %s3233_s16 }
   0xb   : > { %p26_p1 = scmp.eq.s32.totalorder %s25_s23, 0  ;;  %p36_p2 = scmp.eq.s32.totalorder %s3241_s18, 0 }
   0xc   : > { %p41_p3 = scmp.ne.s32.totalorder %s3233_s16, %s3229_s15  ;;  %p42_p4 = scmp.eq.s32.totalorder %s3297_s19, 0 }
   0xd   : > { %s3313_s24 = scalar_select %p26_p1, %s3237_s17, %s28_s22  }
   0xe   : > { %p3315_p5 = por %p36_p2, %p35_p0  ;;  %p3321_p6 = por %p42_p4, %p41_p3 }
   0xf   : > { %p86_p7 = scmp.eq.s32.totalorder %s3297_s19, 1  ;;  %p92_p8 = scmp.eq.s32.totalorder %s1993_s20, 1 }
  0x10   : > { %p1994_p9 = scmp.ge.s32.totalorder %s3241_s18, 1  ;;  %p99_p10 = scmp.lt.s32.totalorder %s3241_s18, 3 }
  0x11   : > { %p3328_p11 = por %p86_p7, %p35_p0  ;;  %p3332_p12 = por %p92_p8, %p41_p3 }
  0x12   : > { %p3336_p13 = pnand %p1994_p9, %p99_p10  ;;  %s3611_s3 = sld [smem:[#allocation25_spill]] }
  0x13   : > { %s3243_s7 = smov [#allocation11]   ;;  %p2888_p7 = scmp.lt.s32.totalorder %s3241_s18, 2 }
  0x14   : > { %p2875_p0 = pneg %p3336_p13  ;;  %s113_s8 = sshll.u32 %s3243_s7, 4  ;;  %s114_s8 = int_to_ptr.vmem [resolvable:$true] %s113_s8 }
  0x15   : > { %s124_s9 = sand.u32 1, %s3237_s17   ;;  %p3353_p8 = pnand %p2888_p7, %p3315_p5 }
  0x16   : > { %p2876_p3 = pnand %p2875_p0, %p42_p4  ;;  %s1997_s11 = sshll.u32 %s124_s9, 5 }
  0x17   : > { %s2677_s12 = sshll.u32 %s3241_s18, 5  ;;  %s128_s23 = scalar_lea.vmem [#allocation8], %s1997_s11 }
  0x18   : > { %s111_s6 = sshll.u32 %s3611_s3, 4  ;;  %s134_s20 = scalar_lea.hbm %s3600_s0, %s2677_s12  ;;  %s112_s6 = int_to_ptr.hbm [resolvable:$true] %s111_s6 }
  0x19   : > { %2878 = dma.hbm_to_vmem [thread:$0]  (!%p2876_p3), %s112_s6, 64, %s114_s8, [#allocation12]  }
  0x1a   : > { %s135_s22 = sshll.u32 %s134_s20, 4  ;;  %s137_s30 = sshll.u32 %s128_s23, 4  ;;  %s136_s22 = int_to_ptr.hbm [resolvable:$true] %s135_s22  ;;  %s138_s30 = int_to_ptr.vmem [resolvable:$true] %s137_s30 }
  0x1b   : > { %s125_s5 = scalar_lea.sflag [#allocation9], %s124_s9  ;;  %s3089_s7 = sshra.s32 %s136_s22, 4  ;;  %s3090_s7 = int_to_ptr.hbm [resolvable:$true] %s3089_s7 }
  0x1c   : > { %s3091_s25 = scalar_lea.hbm %s3090_s7, 32  ;;  %p3093_p9 = pneg %p3353_p8 }
  0x1d   : > { %p3092_p5 = scmp.ne.s32.totalorder %s3090_s7, %s3091_s25  ;;  %s3096_s3 = scalar_lea.hbm %s3600_s0, 64 }
  0x1e   : > { %p3097_p3 = scmp.lt.s32.totalorder %s3090_s7, %s3600_s0  ;;  %p3098_p7 = scmp.lt.s32.totalorder %s3096_s3, %s3091_s25 }
  0x1f   : > { %p3094_p10 = pnand %p3093_p9, %p3092_p5 }
  0x20   : > { %p3099_p2 = por %p3098_p7, %p3097_p3 }
  0x21   : > { %p3095_p0 = pneg %p3094_p10 }
  0x23   : > { %p3100_p1 = pnand %p3099_p2, %p3095_p0 }
  0x25   : > { %3103 = shalt.err (!%p3100_p1)
}
  0x26   : > { %s3244_s9 = smov 64   ;;  %s3245_s11 = smov 4  }
  0x27   : > { %2882 = dma.hbm_to_vmem [thread:$0]  (!%p3353_p8), %s136_s22, 512, %s138_s30, %s125_s5, %s3244_s9, %s3244_s9, %s3245_s11  }
  0x28   : > { %149 = sbr.rel (%p3336_p13) target bundleno = 875 (0x36b), region = 28  ;;  %s3374_s14 = sand.u32 (!%p3336_p13), 1, %s3233_s16  }
  0x29   : > { %s2002_s20 = sshll.u32 (!%p3336_p13), %s3374_s14, 5  ;;  %s152_s23 = scalar_lea.sflag (!%p3336_p13), [#allocation9], %s3374_s14 }
  0x2a   : > { %s3378_s3 = scalar_lea.vmem (!%p3336_p13), [#allocation8], %s2002_s20 }
  0x2d   : > { %3212 = dma.done.wait (%p3321_p6), %s152_s23, 512  }
  0x2e   : > { %3214 = vsyncadd (%p3321_p6), %s152_s23, 4294966784 }
  0x2f   : > { %3216 = dma.done.wait (%p42_p4), [#allocation12], 64  }
  0x30   : > { %3218 = vsyncadd (%p42_p4), [#allocation12], 4294967232  ;;  %s3388_s29 = scalar_lea.vmem [#allocation13], %s2002_s20  ;;  %p3613_p13 = scmp.ne.s32.totalorder %s3297_s19, 0 }
  0x31   : > { %s195_s30 = sshll.u32 (!%p3613_p13), %s3601_s1, 4  ;;  %s3246_s5 = smov (!%p3613_p13), [#allocation2]   ;;  %s196_s30 = int_to_ptr.hbm [resolvable:$true] %s195_s30 }
  0x32   : > { %187 = sbr.rel (%p3613_p13) target bundleno = 63 (0x3f), region = 40  ;;  %s197_s7 = sshll.u32 (!%p3613_p13), %s3246_s5, 4  ;;  %s198_s7 = int_to_ptr.vmem [resolvable:$true] %s197_s7 }
  0x33   : > { %s209_s6 = sshll.u32 (!%p3613_p13), %s3602_s2, 4  ;;  %s3247_s8 = smov (!%p3613_p13), [#allocation3]   ;;  %s210_s6 = int_to_ptr.hbm [resolvable:$true] %s209_s6 }
  0x34   : > { %200 = dma.hbm_to_vmem [thread:$0]  (!%p3613_p13), %s196_s30, 4096, %s198_s7, [#allocation7] }
  0x35   : > { %s211_s13 = sshll.u32 (!%p3613_p13), %s3247_s8, 4  ;;  %s212_s13 = int_to_ptr.vmem [resolvable:$true] %s211_s13 }
  0x36   : > { %214 = dma.hbm_to_vmem [thread:$0]  (!%p3613_p13), %s210_s6, 4096, %s212_s13, [#allocation7 + $0x1] }
  0x37   : > { %3219 = dma.done.wait [#allocation7], 4096 }
  0x38   : > { %3220 = vsyncadd [#allocation7], 4294963200 }
  0x39   : > { %3221 = dma.done.wait [#allocation7 + $0x1], 4096 }
  0x3a   : > { %3222 = vsyncadd [#allocation7 + $0x1], 4294963200  ;;  %v3248_v0 = vmov 0.0  }
  0x3b   : > { %221 = vst [vmem:[#allocation4] sm:$0xff] %v3248_v0 }
  0x3c   : > { %222 = vst [vmem:[#allocation4 + $0x8] sm:$0xff] %v3248_v0 }
  0x3d   : > { %223 = vst [vmem:[#allocation5 + $0x8] sm:$0xff] %v3248_v0 }
  0x3e   : > { %224 = vst [vmem:[#allocation5] sm:$0xff] %v3248_v0 }
  0x3f PF: > { %s2843_s12 = sshll.u32 %s3297_s19, 5  ;;  %s1894_s23 = sshll.u32 %s3388_s29, 4  ;;  %s1895_s23 = int_to_ptr.vmem [resolvable:$true] %s1894_s23 }
  0x40   : > { %v2136_v1 = vld [vmem:[#allocation2 + $0xe0] sm:$0xf]  ;;  %v2712_v2 = vld [vmem:[#allocation2 + $0xec] sm:$0xf0]  ;;  %v2710_v3 = vld [vmem:[#allocation2 + $0xe4] sm:$0xf]  ;;  %s1893_s20 = scalar_lea.hbm %s3604_s4, %s2843_s12 }
  0x41   : > { %v2137_v4 = vor.u32 %v2712_v2, %v2136_v1  ;;  %v2138_v5 = vld [vmem:[#allocation2 + $0xf0] sm:$0xf0]  ;;  %v2144_v6 = vld [vmem:[#allocation2 + $0xe8] sm:$0xf]  ;;  %v2713_v7 = vld [vmem:[#allocation2 + $0xf4] sm:$0xf0] }
  0x42   : > { %v2141_v8 = vor.u32 %v2710_v3, %v2138_v5  ;;  %v2145_v9 = vor.u32 %v2713_v7, %v2144_v6  ;;  %v2711_v10 = vld [vmem:[#allocation2 + $0xec] sm:$0xf]  ;;  %v2146_v11 = vld [vmem:[#allocation2 + $0xf8] sm:$0xf0]  ;;  %v2120_v12 = vld [vmem:[#allocation2 + $0xc0] sm:$0xf] }
  0x43   : > { %459 = vmatpush.bf16.msra.mxu0 %v2137_v4  ;;  %v2149_v13 = vor.u32 %v2711_v10, %v2146_v11  ;;  %v2708_v14 = vld [vmem:[#allocation2 + $0xcc] sm:$0xf0]  ;;  %v2706_v15 = vld [vmem:[#allocation2 + $0xc4] sm:$0xf]  ;;  %v2122_v16 = vld [vmem:[#allocation2 + $0xd0] sm:$0xf0] }
  0x44   : > { %488 = vmatpush.bf16.msra.mxu1 %v2141_v8  ;;  %517 = vmatpush.bf16.msra.mxu2 %v2145_v9  ;;  %v2121_v17 = vor.u32 %v2708_v14, %v2120_v12  ;;  %v2125_v18 = vor.u32 %v2706_v15, %v2122_v16  ;;  %v2128_v19 = vld [vmem:[#allocation2 + $0xc8] sm:$0xf]  ;;  %v2709_v20 = vld [vmem:[#allocation2 + $0xd4] sm:$0xf0]  ;;  %v2707_v21 = vld [vmem:[#allocation2 + $0xcc] sm:$0xf] }
  0x45   : > { %546 = vmatpush.bf16.msra.mxu3 %v2149_v13  ;;  %v2129_v22 = vor.u32 %v2709_v20, %v2128_v19  ;;  %v2130_v23 = vld [vmem:[#allocation2 + $0xd8] sm:$0xf0]  ;;  %v2104_v24 = vld [vmem:[#allocation2 + $0xa0] sm:$0xf]  ;;  %v2704_v25 = vld [vmem:[#allocation2 + $0xac] sm:$0xf0] }
  0x46   : > { %v2133_v26 = vor.u32 %v2707_v21, %v2130_v23  ;;  %v2702_v27 = vld [vmem:[#allocation2 + $0xa4] sm:$0xf]  ;;  %v2106_v28 = vld [vmem:[#allocation2 + $0xb0] sm:$0xf0]  ;;  %v2112_v29 = vld [vmem:[#allocation2 + $0xa8] sm:$0xf]  ;;  %v2105_v30 = vor.u32 %v2704_v25, %v2104_v24 }
  0x47   : > { %460 = vmatpush.bf16.msra.mxu0 %v2121_v17  ;;  %v2705_v31 = vld [vmem:[#allocation2 + $0xb4] sm:$0xf0]  ;;  %v2703_v32 = vld [vmem:[#allocation2 + $0xac] sm:$0xf]  ;;  %v2114_v33 = vld [vmem:[#allocation2 + $0xb8] sm:$0xf0]  ;;  %v2109_v34 = vor.u32 %v2702_v27, %v2106_v28 }
  0x48   : > { %489 = vmatpush.bf16.msra.mxu1 %v2125_v18  ;;  %518 = vmatpush.bf16.msra.mxu2 %v2129_v22  ;;  %v2113_v35 = vor.u32 %v2705_v31, %v2112_v29  ;;  %v2088_v36 = vld [vmem:[#allocation2 + $0x80] sm:$0xf]  ;;  %v2700_v37 = vld [vmem:[#allocation2 + $0x8c] sm:$0xf0]  ;;  %v2698_v38 = vld [vmem:[#allocation2 + $0x84] sm:$0xf]  ;;  %v2117_v39 = vor.u32 %v2703_v32, %v2114_v33 }
  0x49   : > { %547 = vmatpush.bf16.msra.mxu3 %v2133_v26  ;;  %v2090_v40 = vld [vmem:[#allocation2 + $0x90] sm:$0xf0]  ;;  %v2096_v41 = vld [vmem:[#allocation2 + $0x88] sm:$0xf]  ;;  %v2701_v42 = vld [vmem:[#allocation2 + $0x94] sm:$0xf0]  ;;  %v2089_v45 = vor.u32 %v2700_v37, %v2088_v36 }
  0x4a   : > { %v2699_v43 = vld [vmem:[#allocation2 + $0x8c] sm:$0xf]  ;;  %v2098_v44 = vld [vmem:[#allocation2 + $0x98] sm:$0xf0]  ;;  %v2093_v46 = vor.u32 %v2698_v38, %v2090_v40  ;;  %v2097_v47 = vor.u32 %v2701_v42, %v2096_v41  ;;  %v2072_v48 = vld [vmem:[#allocation2 + $0x60] sm:$0xf] }
  0x4b   : > { %461 = vmatpush.bf16.msra.mxu0 %v2105_v30  ;;  %v2696_v49 = vld [vmem:[#allocation2 + $0x6c] sm:$0xf0]  ;;  %v2694_v50 = vld [vmem:[#allocation2 + $0x64] sm:$0xf]  ;;  %v2101_v51 = vor.u32 %v2699_v43, %v2098_v44  ;;  %v2074_v52 = vld [vmem:[#allocation2 + $0x70] sm:$0xf0] }
  0x4c   : > { %490 = vmatpush.bf16.msra.mxu1 %v2109_v34  ;;  %519 = vmatpush.bf16.msra.mxu2 %v2113_v35  ;;  %v2080_v53 = vld [vmem:[#allocation2 + $0x68] sm:$0xf]  ;;  %v2697_v54 = vld [vmem:[#allocation2 + $0x74] sm:$0xf0]  ;;  %v2695_v55 = vld [vmem:[#allocation2 + $0x6c] sm:$0xf]  ;;  %v2073_v57 = vor.u32 %v2696_v49, %v2072_v48  ;;  %v2077_v58 = vor.u32 %v2694_v50, %v2074_v52 }
  0x4d   : > { %548 = vmatpush.bf16.msra.mxu3 %v2117_v39  ;;  %v2082_v56 = vld [vmem:[#allocation2 + $0x78] sm:$0xf0]  ;;  %v2081_v59 = vor.u32 %v2697_v54, %v2080_v53  ;;  %v2056_v60 = vld [vmem:[#allocation2 + $0x40] sm:$0xf]  ;;  %v2692_v61 = vld [vmem:[#allocation2 + $0x4c] sm:$0xf0] }
  0x4e   : > { %v2690_v62 = vld [vmem:[#allocation2 + $0x44] sm:$0xf]  ;;  %v2085_v63 = vor.u32 %v2695_v55, %v2082_v56  ;;  %v2058_v0 = vld [vmem:[#allocation2 + $0x50] sm:$0xf0]  ;;  %v2064_v1 = vld [vmem:[#allocation2 + $0x48] sm:$0xf]  ;;  %v2057_v5 = vor.u32 %v2692_v61, %v2056_v60 }
  0x4f   : > { %462 = vmatpush.bf16.msra.mxu0 %v2089_v45  ;;  %v2693_v2 = vld [vmem:[#allocation2 + $0x54] sm:$0xf0]  ;;  %v2691_v3 = vld [vmem:[#allocation2 + $0x4c] sm:$0xf]  ;;  %v2066_v4 = vld [vmem:[#allocation2 + $0x58] sm:$0xf0]  ;;  %v2061_v6 = vor.u32 %v2690_v62, %v2058_v0 }
  0x50   : > { %491 = vmatpush.bf16.msra.mxu1 %v2093_v46  ;;  %520 = vmatpush.bf16.msra.mxu2 %v2097_v47  ;;  %v2065_v7 = vor.u32 %v2693_v2, %v2064_v1  ;;  %v2040_v8 = vld [vmem:[#allocation2 + $0x20] sm:$0xf]  ;;  %v2688_v9 = vld [vmem:[#allocation2 + $0x2c] sm:$0xf0]  ;;  %v2686_v10 = vld [vmem:[#allocation2 + $0x24] sm:$0xf]  ;;  %v2069_v11 = vor.u32 %v2691_v3, %v2066_v4 }
  0x51   : > { %549 = vmatpush.bf16.msra.mxu3 %v2101_v51  ;;  %v2042_v12 = vld [vmem:[#allocation2 + $0x30] sm:$0xf0]  ;;  %v2048_v13 = vld [vmem:[#allocation2 + $0x28] sm:$0xf]  ;;  %v2689_v14 = vld [vmem:[#allocation2 + $0x34] sm:$0xf0]  ;;  %v2041_v17 = vor.u32 %v2688_v9, %v2040_v8 }
  0x52   : > { %v2687_v15 = vld [vmem:[#allocation2 + $0x2c] sm:$0xf]  ;;  %v2050_v16 = vld [vmem:[#allocation2 + $0x38] sm:$0xf0]  ;;  %v2024_v18 = vld [vmem:[#allocation2] sm:$0xf]  ;;  %v2045_v19 = vor.u32 %v2686_v10, %v2042_v12  ;;  %v2049_v20 = vor.u32 %v2689_v14, %v2048_v13 }
  0x53   : > { %463 = vmatpush.bf16.msra.mxu0 %v2073_v57  ;;  %v2684_v21 = vld [vmem:[#allocation2 + $0xc] sm:$0xf0]  ;;  %v2682_v22 = vld [vmem:[#allocation2 + $0x4] sm:$0xf]  ;;  %v2026_v23 = vld [vmem:[#allocation2 + $0x10] sm:$0xf0]  ;;  %v2053_v24 = vor.u32 %v2687_v15, %v2050_v16 }
  0x54   : > { %492 = vmatpush.bf16.msra.mxu1 %v2077_v58  ;;  %521 = vmatpush.bf16.msra.mxu2 %v2081_v59  ;;  %v2032_v25 = vld [vmem:[#allocation2 + $0x8] sm:$0xf]  ;;  %v2685_v26 = vld [vmem:[#allocation2 + $0x14] sm:$0xf0]  ;;  %v2683_v27 = vld [vmem:[#allocation2 + $0xc] sm:$0xf]  ;;  %v2025_v31 = vor.u32 %v2684_v21, %v2024_v18  ;;  %v2029_v34 = vor.u32 %v2682_v22, %v2026_v23 }
  0x55   : > { %550 = vmatpush.bf16.msra.mxu3 %v2085_v63  ;;  %v2034_v28 = vld [vmem:[#allocation2 + $0x18] sm:$0xf0]  ;;  %v2264_v29 = vld [vmem:[#allocation3 + $0xe0] sm:$0xf]  ;;  %v2744_v30 = vld [vmem:[#allocation3 + $0xec] sm:$0xf0]  ;;  %v2033_v35 = vor.u32 %v2685_v26, %v2032_v25 }
  0x56   : > { %v2742_v32 = vld [vmem:[#allocation3 + $0xe4] sm:$0xf]  ;;  %v2266_v33 = vld [vmem:[#allocation3 + $0xf0] sm:$0xf0]  ;;  %v2037_v37 = vor.u32 %v2683_v27, %v2034_v28  ;;  %v2265_v38 = vor.u32 %v2744_v30, %v2264_v29  ;;  %v2743_v39 = vld [vmem:[#allocation3 + $0xec] sm:$0xf] }
  0x57   : > { %464 = vmatpush.bf16.msra.mxu0 %v2057_v5  ;;  %v2678_v36 = vld [vmem:[%s3378_s3] sm:$0xff]  ;;  %v2272_v40 = vld [vmem:[#allocation3 + $0xe8] sm:$0xf]  ;;  %v2745_v41 = vld [vmem:[#allocation3 + $0xf4] sm:$0xf0]  ;;  %v2269_v42 = vor.u32 %v2742_v32, %v2266_v33  ;;  %s1881_s10 = scalar_lea.sflag [#allocation10], %s3374_s14 }
  0x58   : > { %493 = vmatpush.bf16.msra.mxu1 %v2061_v6  ;;  %522 = vmatpush.bf16.msra.mxu2 %v2065_v7  ;;  %v2274_v43 = vld [vmem:[#allocation3 + $0xf8] sm:$0xf0]  ;;  %v2248_v44 = vld [vmem:[#allocation3 + $0xc0] sm:$0xf]  ;;  %v2740_v45 = vld [vmem:[#allocation3 + $0xcc] sm:$0xf0]  ;;  %v2273_v48 = vor.u32 %v2745_v41, %v2272_v40 }
  0x59   : > { %551 = vmatpush.bf16.msra.mxu3 %v2069_v11  ;;  %v2738_v46 = vld [vmem:[#allocation3 + $0xc4] sm:$0xf]  ;;  %v2250_v47 = vld [vmem:[#allocation3 + $0xd0] sm:$0xf0]  ;;  %v2277_v49 = vor.u32 %v2743_v39, %v2274_v43  ;;  %v2249_v50 = vor.u32 %v2740_v45, %v2248_v44  ;;  %v2739_v51 = vld [vmem:[#allocation3 + $0xcc] sm:$0xf] }
  0x5a   : > { %v2256_v52 = vld [vmem:[#allocation3 + $0xc8] sm:$0xf]  ;;  %v2741_v53 = vld [vmem:[#allocation3 + $0xd4] sm:$0xf0]  ;;  %v2253_v54 = vor.u32 %v2738_v46, %v2250_v47  ;;  %v2258_v55 = vld [vmem:[#allocation3 + $0xd8] sm:$0xf0] }
  0x5b   : > { %465 = vmatpush.bf16.msra.mxu0 %v2041_v17  ;;  %v2232_v56 = vld [vmem:[#allocation3 + $0xa0] sm:$0xf]  ;;  %v2736_v57 = vld [vmem:[#allocation3 + $0xac] sm:$0xf0]  ;;  %v2734_v58 = vld [vmem:[#allocation3 + $0xa4] sm:$0xf]  ;;  %v2257_v60 = vor.u32 %v2741_v53, %v2256_v52  ;;  %v2261_v61 = vor.u32 %v2739_v51, %v2258_v55 }
  0x5c   : > { %494 = vmatpush.bf16.msra.mxu1 %v2045_v19  ;;  %523 = vmatpush.bf16.msra.mxu2 %v2049_v20  ;;  %v2234_v59 = vld [vmem:[#allocation3 + $0xb0] sm:$0xf0]  ;;  %v2233_v62 = vor.u32 %v2736_v57, %v2232_v56  ;;  %v2735_v63 = vld [vmem:[#allocation3 + $0xac] sm:$0xf]  ;;  %v2240_v0 = vld [vmem:[#allocation3 + $0xa8] sm:$0xf] }
  0x5d   : > { %552 = vmatpush.bf16.msra.mxu3 %v2053_v24  ;;  %v2737_v1 = vld [vmem:[#allocation3 + $0xb4] sm:$0xf0]  ;;  %v2237_v2 = vor.u32 %v2734_v58, %v2234_v59  ;;  %v2242_v3 = vld [vmem:[#allocation3 + $0xb8] sm:$0xf0]  ;;  %v2216_v4 = vld [vmem:[#allocation3 + $0x80] sm:$0xf] }
  0x5e   : > { %v2732_v5 = vld [vmem:[#allocation3 + $0x8c] sm:$0xf0]  ;;  %v2730_v6 = vld [vmem:[#allocation3 + $0x84] sm:$0xf]  ;;  %v2218_v7 = vld [vmem:[#allocation3 + $0x90] sm:$0xf0]  ;;  %v2241_v8 = vor.u32 %v2737_v1, %v2240_v0  ;;  %v2245_v9 = vor.u32 %v2735_v63, %v2242_v3 }
  0x5f   : > { %466 = vmatpush.bf16.msra.mxu0 %v2025_v31  ;;  %v2217_v10 = vor.u32 %v2732_v5, %v2216_v4  ;;  %v2731_v11 = vld [vmem:[#allocation3 + $0x8c] sm:$0xf]  ;;  %v2224_v12 = vld [vmem:[#allocation3 + $0x88] sm:$0xf]  ;;  %v2733_v13 = vld [vmem:[#allocation3 + $0x94] sm:$0xf0]  ;;  %v2221_v14 = vor.u32 %v2730_v6, %v2218_v7 }
  0x60   : > { %495 = vmatpush.bf16.msra.mxu1 %v2029_v34  ;;  %524 = vmatpush.bf16.msra.mxu2 %v2033_v35  ;;  %v2226_v15 = vld [vmem:[#allocation3 + $0x98] sm:$0xf0]  ;;  %v2200_v16 = vld [vmem:[#allocation3 + $0x60] sm:$0xf]  ;;  %v2728_v17 = vld [vmem:[#allocation3 + $0x6c] sm:$0xf0]  ;;  %v2225_v21 = vor.u32 %v2733_v13, %v2224_v12 }
  0x61   : > { %553 = vmatpush.bf16.msra.mxu3 %v2037_v37  ;;  %v2726_v18 = vld [vmem:[#allocation3 + $0x64] sm:$0xf]  ;;  %v2202_v19 = vld [vmem:[#allocation3 + $0x70] sm:$0xf0]  ;;  %v2679_v20 = vld [vmem:[%s3378_s3 + $0x8] sm:$0xff]  ;;  %v2229_v22 = vor.u32 %v2731_v11, %v2226_v15  ;;  %v2201_v23 = vor.u32 %v2728_v17, %v2200_v16  ;;  %s3187_s7 = scalar_lea.hbm %s3604_s4, 64 }
  0x62   : > { %467 = vmatmul.bf16.vlgmr.msra.gmra.mxu0 %v2678_v36  ;;  %v2727_v24 = vld [vmem:[#allocation3 + $0x6c] sm:$0xf]  ;;  %v2208_v25 = vld [vmem:[#allocation3 + $0x68] sm:$0xf]  ;;  %v2729_v26 = vld [vmem:[#allocation3 + $0x74] sm:$0xf0]  ;;  %v2205_v27 = vor.u32 %v2726_v18, %v2202_v19 }
  0x63   : > { %812 = vmatpush.bf16.msrb.mxu0 %v2265_v38  ;;  %496 = vmatmul.bf16.vlgmr.msra.gmra.mxu1 %v2678_v36  ;;  %v2210_v28 = vld [vmem:[#allocation3 + $0x78] sm:$0xf0]  ;;  %v2184_v29 = vld [vmem:[#allocation3 + $0x40] sm:$0xf]  ;;  %v2724_v30 = vld [vmem:[#allocation3 + $0x4c] sm:$0xf0]  ;;  %v2209_v33 = vor.u32 %v2729_v26, %v2208_v25 }
  0x64   : > { %826 = vmatpush.bf16.msrb.mxu1 %v2269_v42  ;;  %525 = vmatmul.bf16.vlgmr.msra.gmra.mxu2 %v2678_v36  ;;  %v2722_v31 = vld [vmem:[#allocation3 + $0x44] sm:$0xf]  ;;  %v2186_v32 = vld [vmem:[#allocation3 + $0x50] sm:$0xf0]  ;;  %v2213_v34 = vor.u32 %v2727_v24, %v2210_v28  ;;  %v2185_v35 = vor.u32 %v2724_v30, %v2184_v29  ;;  %v2725_v37 = vld [vmem:[#allocation3 + $0x54] sm:$0xf0] }
  0x65   : > { %554 = vmatmul.bf16.vlgmr.msra.gmra.mxu3 %v2678_v36  ;;  %840 = vmatpush.bf16.msrb.mxu2 %v2273_v48  ;;  %v2192_v36 = vld [vmem:[#allocation3 + $0x48] sm:$0xf]  ;;  %v2189_v38 = vor.u32 %v2722_v31, %v2186_v32  ;;  %v2723_v39 = vld [vmem:[#allocation3 + $0x4c] sm:$0xf]  ;;  %v2194_v40 = vld [vmem:[#allocation3 + $0x58] sm:$0xf0] }
  0x66   : > { %854 = vmatpush.bf16.msrb.mxu3 %v2277_v49  ;;  %v2193_v41 = vor.u32 %v2725_v37, %v2192_v36  ;;  %v2168_v42 = vld [vmem:[#allocation3 + $0x20] sm:$0xf]  ;;  %v2720_v43 = vld [vmem:[#allocation3 + $0x2c] sm:$0xf0]  ;;  %v2718_v44 = vld [vmem:[#allocation3 + $0x24] sm:$0xf]  ;;  %v2197_v45 = vor.u32 %v2723_v39, %v2194_v40 }
  0x67   : > { %813 = vmatpush.bf16.msrb.mxu0 %v2249_v50  ;;  %v2169_v46 = vor.u32 %v2720_v43, %v2168_v42  ;;  %v2170_v47 = vld [vmem:[#allocation3 + $0x30] sm:$0xf0]  ;;  %v2719_v48 = vld [vmem:[#allocation3 + $0x2c] sm:$0xf]  ;;  %v2178_v49 = vld [vmem:[#allocation3 + $0x38] sm:$0xf0] }
  0x68   : > { %827 = vmatpush.bf16.msrb.mxu1 %v2253_v54  ;;  %v2173_v50 = vor.u32 %v2718_v44, %v2170_v47  ;;  %v2176_v51 = vld [vmem:[#allocation3 + $0x28] sm:$0xf]  ;;  %v2721_v52 = vld [vmem:[#allocation3 + $0x34] sm:$0xf0]  ;;  %v2152_v53 = vld [vmem:[#allocation3] sm:$0xf]  ;;  %v2181_v58 = vor.u32 %v2719_v48, %v2178_v49 }
  0x69   : > { %841 = vmatpush.bf16.msrb.mxu2 %v2257_v60  ;;  %v2716_v54 = vld [vmem:[#allocation3 + $0xc] sm:$0xf0]  ;;  %v2714_v55 = vld [vmem:[#allocation3 + $0x4] sm:$0xf]  ;;  %v2154_v56 = vld [vmem:[#allocation3 + $0x10] sm:$0xf0]  ;;  %v2177_v57 = vor.u32 %v2721_v52, %v2176_v51 }
  0x6a   : > { %855 = vmatpush.bf16.msrb.mxu3 %v2261_v61  ;;  %v2153_v59 = vor.u32 %v2716_v54, %v2152_v53  ;;  %v2160_v60 = vld [vmem:[#allocation3 + $0x8] sm:$0xf]  ;;  %v2717_v61 = vld [vmem:[#allocation3 + $0x14] sm:$0xf0]  ;;  %v2715_v63 = vld [vmem:[#allocation3 + $0xc] sm:$0xf] }
  0x6b   : > { %814 = vmatpush.bf16.msrb.mxu0 %v2233_v62  ;;  %v2157_v62 = vor.u32 %v2714_v55, %v2154_v56  ;;  %v2162_v0 = vld [vmem:[#allocation3 + $0x18] sm:$0xf0]  ;;  %v2161_v1 = vor.u32 %v2717_v61, %v2160_v60  ;;  %v2680_v3 = vld [vmem:[%s3378_s3 + $0x10] sm:$0xff]  ;;  %v607_v5 = vld [vmem:[#allocation4] sm:$0xff] }
  0x6c   : > { %828 = vmatpush.bf16.msrb.mxu1 %v2237_v2  ;;  %v2165_v2 = vor.u32 %v2715_v63, %v2162_v0  ;;  %v2681_v4 = vld [vmem:[%s3378_s3 + $0x18] sm:$0xff]  ;;  %v608_v6 = vld [vmem:[#allocation4 + $0x8] sm:$0xff]  ;;  %v2394_v61 = vld [vmem:[#allocation3 + $0xf0] sm:$0xf0]  ;;  %s1896_s3 = sshll.u32 %s1893_s20, 4  ;;  %s1897_s3 = int_to_ptr.hbm [resolvable:$true] %s1896_s3 }
  0x6d   : > { %842 = vmatpush.bf16.msrb.mxu2 %v2241_v8  ;;  %v619_v7 = vpack.c.bf16 %v608_v6, %v607_v5  ;;  %v2777_v63 = vld [vmem:[#allocation3 + $0xf4] sm:$0xf0]  ;;  %s3181_s22 = sshra.s32 %s1897_s3, 4  ;;  %s3182_s22 = int_to_ptr.hbm [resolvable:$true] %s3181_s22 }
  0x6e   : > { %856 = vmatpush.bf16.msrb.mxu3 %v2245_v9  ;;  %s3183_s19 = scalar_lea.hbm %s3182_s22, 32  ;;  %p3188_p2 = scmp.lt.s32.totalorder %s3182_s22, %s3604_s4 }
  0x6f   : > { %815 = vmatpush.bf16.msrb.mxu0 %v2217_v10  ;;  %p3184_p4 = scmp.ne.s32.totalorder %s3182_s22, %s3183_s19  ;;  %p3189_p8 = scmp.lt.s32.totalorder %s3187_s7, %s3183_s19 }
  0x70   : > { %829 = vmatpush.bf16.msrb.mxu1 %v2221_v14  ;;  %v265_v14 = vld [vmem:[#allocation11] sm:$0xf] }
  0x71   : > { %843 = vmatpush.bf16.msrb.mxu2 %v2225_v21  ;;  %v3414_v15 = vperm.slane %v265_v14, 0  ;;  %v3418_v17 = vperm.slane %v265_v14, 1  ;;  %v3430_v24 = vperm.slane %v265_v14, 3  ;;  %p3185_p6 = pnand %p3184_p4, %p3328_p11  ;;  %p3190_p5 = por %p3189_p8, %p3188_p2 }
  0x72   : > { %857 = vmatpush.bf16.msrb.mxu3 %v2229_v22  ;;  %472 = vmatmul.bf16.gmra.mxu0 %v2679_v20 }
  0x73   : > { %816 = vmatpush.bf16.msrb.mxu0 %v2201_v23  ;;  %501 = vmatmul.bf16.gmra.mxu1 %v2679_v20  ;;  %v3428_v23 = vperm.slane %v265_v14, 2  ;;  %p3186_p1 = pneg %p3185_p6 }
  0x74   : > { %830 = vmatpush.bf16.msrb.mxu1 %v2205_v27  ;;  %530 = vmatmul.bf16.gmra.mxu2 %v2679_v20 }
  0x75   : > { %559 = vmatmul.bf16.gmra.mxu3 %v2679_v20  ;;  %844 = vmatpush.bf16.msrb.mxu2 %v2209_v33  ;;  %p3191_p9 = pnand %p3190_p5, %p3186_p1 }
  0x76   : > { %858 = vmatpush.bf16.msrb.mxu3 %v2213_v34 }
  0x77   : > { %817 = vmatpush.bf16.msrb.mxu0 %v2185_v35 }
  0x78   : > { %831 = vmatpush.bf16.msrb.mxu1 %v2189_v38 }
  0x79   : > { %845 = vmatpush.bf16.msrb.mxu2 %v2193_v41 }
  0x7a   : > { %859 = vmatpush.bf16.msrb.mxu3 %v2197_v45 }
  0x7b   : > { %818 = vmatpush.bf16.msrb.mxu0 %v2169_v46 }
  0x7c   : > { %832 = vmatpush.bf16.msrb.mxu1 %v2173_v50 }
  0x7d   : > { %846 = vmatpush.bf16.msrb.mxu2 %v2177_v57  ;;  %v2392_v57 = vld [vmem:[#allocation3 + $0xe0] sm:$0xf] }
  0x7e   : > { %860 = vmatpush.bf16.msrb.mxu3 %v2181_v58  ;;  %v2776_v58 = vld [vmem:[#allocation3 + $0xec] sm:$0xf0] }
  0x7f   : > { %819 = vmatpush.bf16.msrb.mxu0 %v2153_v59  ;;  %v2774_v59 = vld [vmem:[#allocation3 + $0xe4] sm:$0xf]  ;;  %v2393_v60 = vor.u32 %v2776_v58, %v2392_v57 }
  0x80   : > { %833 = vmatpush.bf16.msrb.mxu1 %v2157_v62  ;;  %v2400_v62 = vld [vmem:[#allocation3 + $0xe8] sm:$0xf]  ;;  %v2766_v57 = vld [vmem:[#allocation3 + $0xa4] sm:$0xf] }
  0x81   : > { %847 = vmatpush.bf16.msrb.mxu2 %v2161_v1  ;;  %v2397_v1 = vor.u32 %v2774_v59, %v2394_v61  ;;  %v2362_v59 = vld [vmem:[#allocation3 + $0xb0] sm:$0xf0]  ;;  %v2769_v61 = vld [vmem:[#allocation3 + $0xb4] sm:$0xf0] }
  0x82   : > { %861 = vmatpush.bf16.msrb.mxu3 %v2165_v2  ;;  %477 = vmatmul.bf16.gmra.mxu0 %v2680_v3  ;;  %v2401_v2 = vor.u32 %v2777_v63, %v2400_v62 }
  0x83   : > { %506 = vmatmul.bf16.gmra.mxu1 %v2680_v3  ;;  %1129 = vmatpush.bf16.msra.mxu0 %v2393_v60  ;;  %v2368_v60 = vld [vmem:[#allocation3 + $0xa8] sm:$0xf] }
  0x84   : > { %535 = vmatmul.bf16.gmra.mxu2 %v2680_v3  ;;  %1143 = vmatpush.bf16.msra.mxu1 %v2397_v1  ;;  %v2369_v1 = vor.u32 %v2769_v61, %v2368_v60  ;;  %v2328_v60 = vld [vmem:[#allocation3 + $0x60] sm:$0xf]  ;;  %v2760_v61 = vld [vmem:[#allocation3 + $0x6c] sm:$0xf0] }
  0x85   : > { %564 = vmatmul.bf16.gmra.mxu3 %v2680_v3  ;;  %v2775_v3 = vld [vmem:[#allocation3 + $0xec] sm:$0xf]  ;;  %1157 = vmatpush.bf16.msra.mxu2 %v2401_v2 }
  0x86   : > { %v2767_v2 = vld [vmem:[#allocation3 + $0xac] sm:$0xf] }
  0x92   : > { %482 = vmatmul.bf16.gmra.mxu0 %v2681_v4 }
  0x93   : > { %511 = vmatmul.bf16.gmra.mxu1 %v2681_v4 }
  0x94   : > { %540 = vmatmul.bf16.gmra.mxu2 %v2681_v4 }
  0x95   : > { %569 = vmatmul.bf16.gmra.mxu3 %v2681_v4  ;;  %v2402_v4 = vld [vmem:[#allocation3 + $0xf8] sm:$0xf0] }
  0x96   : > { %v2405_v14 = vor.u32 %v2775_v3, %v2402_v4  ;;  %v2370_v3 = vld [vmem:[#allocation3 + $0xb8] sm:$0xf0] }
  0x98   : > { %1171 = vmatpush.bf16.msra.mxu3 %v2405_v14 }
  0xa2   : > { %820 = vmatmul.bf16.vlgmr.msrb.gmra.mxu0 %v619_v7 }
  0xa3   : > { %834 = vmatmul.bf16.vlgmr.msrb.gmra.mxu1 %v619_v7 }
  0xa4   : > { %848 = vmatmul.bf16.vlgmr.msrb.gmra.mxu2 %v619_v7 }
  0xa5   : > { %862 = vmatmul.bf16.vlgmr.msrb.gmra.mxu3 %v619_v7 }
  0xdf   : > { %v3402_v8 = vpop.f32.mrf.mxu0 }
  0xe0   : > { %v3404_v9 = vpop.f32.mrf.mxu1  ;;  %v469_v62 = vadd.f32 %v3402_v8, %v3414_v15 }
  0xe1   : > { %v498_v4 = vadd.f32 %v3404_v9, %v3418_v17  ;;  %v2762_v9 = vld [vmem:[#allocation3 + $0x84] sm:$0xf] }
  0xe7   : > { %v3406_v10 = vpop.f32.mrf.mxu2  ;;  %v3410_v12 = vpop.f32.mrf.mxu0 }
  0xe8   : > { %v3408_v11 = vpop.f32.mrf.mxu3  ;;  %v3412_v13 = vpop.f32.mrf.mxu1 }
  0xef   : > { %v3416_v16 = vpop.f32.mrf.mxu2  ;;  %v473_v19 = vpop.f32.mrf.mxu0 }
  0xf0   : > { %v3420_v18 = vpop.f32.mrf.mxu3  ;;  %v3423_v20 = vadd.f32 %v473_v19, %v3414_v15  ;;  %v502_v21 = vpop.f32.mrf.mxu1 }
  0xf1   : > { %v3426_v22 = vadd.f32 %v502_v21, %v3418_v17 }
  0xf7   : > { %v531_v25 = vpop.f32.mrf.mxu2  ;;  %v475_v28 = vpop.f32.mrf.mxu0 }
  0xf8   : > { %v3433_v26 = vadd.f32 %v531_v25, %v3428_v23  ;;  %v560_v27 = vpop.f32.mrf.mxu3  ;;  %v3439_v30 = vadd.f32 %v475_v28, %v3414_v15  ;;  %v504_v31 = vpop.f32.mrf.mxu1  ;;  %v2772_v28 = vld [vmem:[#allocation3 + $0xcc] sm:$0xf0] }
  0xf9   : > { %v3436_v29 = vadd.f32 %v560_v27, %v3430_v24  ;;  %v3442_v32 = vadd.f32 %v504_v31, %v3418_v17  ;;  %v2376_v27 = vld [vmem:[#allocation3 + $0xc0] sm:$0xf]  ;;  %v2770_v31 = vld [vmem:[#allocation3 + $0xc4] sm:$0xf] }
  0xff   : > { %v533_v33 = vpop.f32.mrf.mxu2  ;;  %v478_v36 = vpop.f32.mrf.mxu0 }
 0x100   : > { %v3445_v34 = vadd.f32 %v533_v33, %v3428_v23  ;;  %v562_v35 = vpop.f32.mrf.mxu3  ;;  %v3451_v38 = vadd.f32 %v478_v36, %v3414_v15  ;;  %v507_v39 = vpop.f32.mrf.mxu1  ;;  %v2378_v36 = vld [vmem:[#allocation3 + $0xd0] sm:$0xf0] }
 0x101   : > { %v3448_v37 = vadd.f32 %v562_v35, %v3430_v24  ;;  %v3454_v40 = vadd.f32 %v507_v39, %v3418_v17  ;;  %v2377_v35 = vor.u32 %v2772_v28, %v2376_v27  ;;  %v2384_v39 = vld [vmem:[#allocation3 + $0xc8] sm:$0xf] }
 0x103   : > { %1130 = vmatpush.bf16.msra.mxu0 %v2377_v35  ;;  %v2764_v35 = vld [vmem:[#allocation3 + $0x8c] sm:$0xf0] }
 0x107   : > { %v536_v41 = vpop.f32.mrf.mxu2  ;;  %v480_v44 = vpop.f32.mrf.mxu0 }
 0x108   : > { %v3457_v42 = vadd.f32 %v536_v41, %v3428_v23  ;;  %v565_v43 = vpop.f32.mrf.mxu3  ;;  %v3463_v46 = vadd.f32 %v480_v44, %v3414_v15  ;;  %v509_v47 = vpop.f32.mrf.mxu1  ;;  %v2773_v41 = vld [vmem:[#allocation3 + $0xd4] sm:$0xf0] }
 0x109   : > { %v3460_v45 = vadd.f32 %v565_v43, %v3430_v24  ;;  %v3466_v48 = vadd.f32 %v509_v47, %v3418_v17  ;;  %v2381_v43 = vor.u32 %v2770_v31, %v2378_v36  ;;  %v2385_v44 = vor.u32 %v2773_v41, %v2384_v39  ;;  %v2771_v47 = vld [vmem:[#allocation3 + $0xcc] sm:$0xf]  ;;  %v2344_v31 = vld [vmem:[#allocation3 + $0x80] sm:$0xf]  ;;  %v2346_v41 = vld [vmem:[#allocation3 + $0x90] sm:$0xf0] }
 0x10a   : > { %v2345_v39 = vor.u32 %v2764_v35, %v2344_v31  ;;  %v500_v31 = vadd.f32 %v3412_v13, %v3418_v17  ;;  %v2320_v13 = vld [vmem:[#allocation3 + $0x48] sm:$0xf] }
 0x10b   : > { %1144 = vmatpush.bf16.msra.mxu1 %v2381_v43  ;;  %1158 = vmatpush.bf16.msra.mxu2 %v2385_v44  ;;  %v2352_v43 = vld [vmem:[#allocation3 + $0x88] sm:$0xf] }
 0x10f   : > { %v538_v49 = vpop.f32.mrf.mxu2  ;;  %v483_v52 = vpop.f32.mrf.mxu0  ;;  %1159 = vmatpush.bf16.msra.mxu2 %v2369_v1  ;;  %v2330_v1 = vld [vmem:[#allocation3 + $0x70] sm:$0xf0] }
 0x110   : > { %v3469_v50 = vadd.f32 %v538_v49, %v3428_v23  ;;  %v567_v51 = vpop.f32.mrf.mxu3  ;;  %v3475_v54 = vadd.f32 %v483_v52, %v3414_v15  ;;  %v512_v55 = vpop.f32.mrf.mxu1  ;;  %v2386_v49 = vld [vmem:[#allocation3 + $0xd8] sm:$0xf0]  ;;  %v2360_v52 = vld [vmem:[#allocation3 + $0xa0] sm:$0xf] }
 0x111   : > { %v3472_v53 = vadd.f32 %v567_v51, %v3430_v24  ;;  %v3478_v56 = vadd.f32 %v512_v55, %v3418_v17  ;;  %v2389_v51 = vor.u32 %v2771_v47, %v2386_v49  ;;  %v2768_v55 = vld [vmem:[#allocation3 + $0xac] sm:$0xf0]  ;;  %v2349_v47 = vor.u32 %v2762_v9, %v2346_v41  ;;  %v2765_v49 = vld [vmem:[#allocation3 + $0x94] sm:$0xf0] }
 0x112   : > { %v2361_v58 = vor.u32 %v2768_v55, %v2360_v52  ;;  %v2353_v55 = vor.u32 %v2765_v49, %v2352_v43  ;;  %v2312_v43 = vld [vmem:[#allocation3 + $0x40] sm:$0xf] }
 0x113   : > { %1172 = vmatpush.bf16.msra.mxu3 %v2389_v51  ;;  %v2763_v51 = vld [vmem:[#allocation3 + $0x8c] sm:$0xf] }
 0x114   : > { %1131 = vmatpush.bf16.msra.mxu0 %v2361_v58  ;;  %1160 = vmatpush.bf16.msra.mxu2 %v2353_v55 }
 0x117   : > { %v541_v0 = vpop.f32.mrf.mxu2  ;;  %v485_v7 = vpop.f32.mrf.mxu0 }
 0x118   : > { %v3481_v5 = vadd.f32 %v541_v0, %v3428_v23  ;;  %v570_v6 = vpop.f32.mrf.mxu3  ;;  %v3487_v21 = vadd.f32 %v485_v7, %v3414_v15  ;;  %v514_v25 = vpop.f32.mrf.mxu1  ;;  %v2365_v0 = vor.u32 %v2766_v57, %v2362_v59  ;;  %1132 = vmatpush.bf16.msra.mxu0 %v2345_v39  ;;  %v2354_v57 = vld [vmem:[#allocation3 + $0x98] sm:$0xf0] }
 0x119   : > { %v3484_v19 = vadd.f32 %v570_v6, %v3430_v24  ;;  %v3490_v33 = vadd.f32 %v514_v25, %v3418_v17  ;;  %v2373_v25 = vor.u32 %v2767_v2, %v2370_v3  ;;  %v2357_v59 = vor.u32 %v2763_v51, %v2354_v57  ;;  %v2338_v39 = vld [vmem:[#allocation3 + $0x78] sm:$0xf0]  ;;  %v2757_v17 = vld [vmem:[#allocation3 + $0x54] sm:$0xf0] }
 0x11a   : > { %1145 = vmatpush.bf16.msra.mxu1 %v2365_v0  ;;  %v2758_v0 = vld [vmem:[#allocation3 + $0x64] sm:$0xf]  ;;  %v556_v2 = vadd.f32 %v3408_v11, %v3430_v24  ;;  %v471_v3 = vadd.f32 %v3410_v12, %v3414_v15 }
 0x11b   : > { %1173 = vmatpush.bf16.msra.mxu3 %v2373_v25  ;;  %v2761_v25 = vld [vmem:[#allocation3 + $0x74] sm:$0xf0] }
 0x11e   : > { %1146 = vmatpush.bf16.msra.mxu1 %v2349_v47  ;;  %v2754_v47 = vld [vmem:[#allocation3 + $0x44] sm:$0xf] }
 0x11f   : > { %v543_v63 = vpop.f32.mrf.mxu2  ;;  %v821_v14 = vpop.f32.mrf.mxu0  ;;  %1174 = vmatpush.bf16.msra.mxu3 %v2357_v59  ;;  %v2321_v59 = vor.u32 %v2757_v17, %v2320_v13  ;;  %v2288_v13 = vld [vmem:[#allocation3 + $0x8] sm:$0xf]  ;;  %v529_v17 = vadd.f32 %v3416_v16, %v3428_v23 }
 0x120   : > { %v3497_v6 = vadd.f32 %v543_v63, %v3428_v23  ;;  %v572_v7 = vpop.f32.mrf.mxu3  ;;  %v868_v28 = vadd.f32 %v821_v14, %v469_v62  ;;  %v835_v8 = vpop.f32.mrf.mxu1  ;;  %v2329_v63 = vor.u32 %v2760_v61, %v2328_v60  ;;  %v2336_v14 = vld [vmem:[#allocation3 + $0x68] sm:$0xf]  ;;  %v2755_v60 = vld [vmem:[#allocation3 + $0x4c] sm:$0xf]  ;;  %v2322_v61 = vld [vmem:[#allocation3 + $0x58] sm:$0xf0] }
 0x121   : > { %v3500_v27 = vadd.f32 %v572_v7, %v3430_v24  ;;  %v869_v36 = vadd.f32 %v835_v8, %v498_v4  ;;  %v2333_v7 = vor.u32 %v2758_v0, %v2330_v1  ;;  %v527_v8 = vadd.f32 %v3406_v10, %v3428_v23 }
 0x122   : > { %v876_v44 = vsub.f32 0.0, %v868_v28  ;;  %v2759_v28 = vld [vmem:[#allocation3 + $0x6c] sm:$0xf]  ;;  %1133 = vmatpush.bf16.msra.mxu0 %v2329_v63  ;;  %v2337_v11 = vor.u32 %v2761_v25, %v2336_v14  ;;  %v2325_v63 = vor.u32 %v2755_v60, %v2322_v61  ;;  %v2752_v25 = vld [vmem:[#allocation3 + $0x2c] sm:$0xf0] }
 0x123   : > { %v886_v52 = vsub.f32 0.0, %v869_v36  ;;  %1147 = vmatpush.bf16.msra.mxu1 %v2333_v7  ;;  %v2341_v41 = vor.u32 %v2759_v28, %v2338_v39  ;;  %v558_v28 = vadd.f32 %v3420_v18, %v3430_v24  ;;  %v2290_v61 = vld [vmem:[#allocation3 + $0x18] sm:$0xf0] }
 0x124   : > { %v878_v58 = vmul.f32 1.442695, %v876_v44  ;;  %v2756_v44 = vld [vmem:[#allocation3 + $0x4c] sm:$0xf0]  ;;  %1161 = vmatpush.bf16.msra.mxu2 %v2337_v11 }
 0x125   : > { %v888_v62 = vmul.f32 1.442695, %v886_v52  ;;  %v2313_v10 = vor.u32 %v2756_v44, %v2312_v43  ;;  %v2314_v52 = vld [vmem:[#allocation3 + $0x50] sm:$0xf0]  ;;  %1175 = vmatpush.bf16.msra.mxu3 %v2341_v41  ;;  %v2306_v44 = vld [vmem:[#allocation3 + $0x38] sm:$0xf0] }
 0x126   : > { %2931 = vpow2.f32 %v878_v58  ;;  %v2317_v58 = vor.u32 %v2754_v47, %v2314_v52  ;;  %v2280_v47 = vld [vmem:[#allocation3] sm:$0xf]  ;;  %v2282_v52 = vld [vmem:[#allocation3 + $0x10] sm:$0xf0] }
 0x127   : > { %v849_v4 = vpop.f32.mrf.mxu2  ;;  %2933 = vpow2.f32 %v888_v62  ;;  %v823_v36 = vpop.f32.mrf.mxu0  ;;  %1134 = vmatpush.bf16.msra.mxu0 %v2313_v10  ;;  %v2746_v10 = vld [vmem:[#allocation3 + $0x4] sm:$0xf] }
 0x128   : > { %v863_v35 = vpop.f32.mrf.mxu3  ;;  %v872_v15 = vadd.f32 %v823_v36, %v471_v3  ;;  %v837_v9 = vpop.f32.mrf.mxu1  ;;  %v870_v49 = vadd.f32 %v849_v4, %v527_v8  ;;  %1148 = vmatpush.bf16.msra.mxu1 %v2317_v58  ;;  %v2296_v3 = vld [vmem:[#allocation3 + $0x20] sm:$0xf]  ;;  %1162 = vmatpush.bf16.msra.mxu2 %v2321_v59  ;;  %v2298_v36 = vld [vmem:[#allocation3 + $0x30] sm:$0xf0]  ;;  %v2749_v58 = vld [vmem:[#allocation3 + $0x14] sm:$0xf0] }
 0x129   : > { %v871_v12 = vadd.f32 %v863_v35, %v556_v2  ;;  %v873_v51 = vadd.f32 %v837_v9, %v500_v31  ;;  %1176 = vmatpush.bf16.msra.mxu3 %v2325_v63  ;;  %v2297_v31 = vor.u32 %v2752_v25, %v2296_v3  ;;  %v2750_v35 = vld [vmem:[#allocation3 + $0x24] sm:$0xf]  ;;  %v2751_v9 = vld [vmem:[#allocation3 + $0x2c] sm:$0xf]  ;;  %v2289_v60 = vor.u32 %v2749_v58, %v2288_v13  ;;  %v609_v63 = vld [vmem:[#allocation5 + $0x8] sm:$0xff] }
 0x12a   : > { %v877_v57 = vsub.f32 0.0, %v872_v15  ;;  %2935 = vtanh.f32 %v870_v49  ;;  %v2301_v39 = vor.u32 %v2750_v35, %v2298_v36  ;;  %v2753_v15 = vld [vmem:[#allocation3 + $0x34] sm:$0xf0]  ;;  %v2309_v24 = vor.u32 %v2751_v9, %v2306_v44  ;;  %v2747_v59 = vld [vmem:[#allocation3 + $0xc] sm:$0xf] }
 0x12b   : > { %v898_v55 = vsub.f32 0.0, %v871_v12  ;;  %v887_v62 = vsub.f32 0.0, %v873_v51  ;;  %v2304_v12 = vld [vmem:[#allocation3 + $0x28] sm:$0xf]  ;;  %1135 = vmatpush.bf16.msra.mxu0 %v2297_v31  ;;  %v2748_v51 = vld [vmem:[#allocation3 + $0xc] sm:$0xf0] }
 0x12c   : > { %v2932_v0 = vpop.eup %2931  ;;  %v880_v2 = vmul.f32 1.442695, %v877_v57  ;;  %v2305_v43 = vor.u32 %v2753_v15, %v2304_v12  ;;  %1149 = vmatpush.bf16.msra.mxu1 %v2301_v39  ;;  %v2281_v49 = vor.u32 %v2748_v51, %v2280_v47  ;;  %v2285_v57 = vor.u32 %v2746_v10, %v2282_v52  ;;  %v610_v15 = vld [vmem:[#allocation5] sm:$0xff] }
 0x12d   : > { %v900_v1 = vmul.f32 1.442695, %v898_v55  ;;  %v2934_v4 = vpop.eup %2933  ;;  %v882_v7 = vadd.f32 1.0, %v2932_v0  ;;  %v890_v14 = vmul.f32 1.442695, %v887_v62  ;;  %1177 = vmatpush.bf16.msra.mxu3 %v2309_v24 }
 0x12e   : > { %v892_v8 = vadd.f32 1.0, %v2934_v4  ;;  %1163 = vmatpush.bf16.msra.mxu2 %v2305_v43 }
 0x12f   : > { %2937 = vrcp.f32 %v882_v7  ;;  %v851_v18 = vpop.f32.mrf.mxu2  ;;  %1136 = vmatpush.bf16.msra.mxu0 %v2281_v49 }
 0x130   : > { %v865_v11 = vpop.f32.mrf.mxu3  ;;  %2939 = vrcp.f32 %v892_v8  ;;  %v2936_v62 = vpop.eup %2935  ;;  %v874_v0 = vadd.f32 %v851_v18, %v529_v17  ;;  %1150 = vmatpush.bf16.msra.mxu1 %v2285_v57 }
 0x131   : > { %v875_v41 = vadd.f32 %v865_v11, %v558_v28  ;;  %2941 = vpow2.f32 %v880_v2  ;;  %v2293_v2 = vor.u32 %v2747_v59, %v2290_v61  ;;  %v2522_v59 = vld [vmem:[#allocation3 + $0xe0] sm:$0xf]  ;;  %v2806_v61 = vld [vmem:[#allocation3 + $0xe4] sm:$0xf] }
 0x132   : > { %2943 = vpow2.f32 %v890_v14  ;;  %1164 = vmatpush.bf16.msra.mxu2 %v2289_v60  ;;  %v2808_v60 = vld [vmem:[#allocation3 + $0xec] sm:$0xf0] }
 0x133   : > { %v899_v55 = vsub.f32 0.0, %v875_v41  ;;  %2945 = vpow2.f32 %v900_v1  ;;  %1178 = vmatpush.bf16.msra.mxu3 %v2293_v2  ;;  %v2809_v2 = vld [vmem:[#allocation3 + $0xf4] sm:$0xf0] }
 0x134   : > { %2947 = vtanh.f32 %v874_v0  ;;  %v2530_v0 = vld [vmem:[#allocation3 + $0xe8] sm:$0xf] }
 0x135   : > { %v2938_v3 = vpop.eup %2937  ;;  %v902_v4 = vmul.f32 1.442695, %v899_v55 }
 0x136   : > { %v2940_v7 = vpop.eup %2939  ;;  %v910_v25 = vmul.f32 %v2938_v3, %v2936_v62  ;;  %v2523_v62 = vor.u32 %v2808_v60, %v2522_v59  ;;  %v2794_v59 = vld [vmem:[#allocation3 + $0x84] sm:$0xf] }
 0x137   : > { %v2942_v16 = vpop.eup %2941  ;;  %v908_v23 = vmul.f32 %v2940_v7, %v609_v63  ;;  %2949 = vpow2.f32 %v902_v4  ;;  %v2524_v63 = vld [vmem:[#allocation3 + $0xf0] sm:$0xf0]  ;;  %v2531_v4 = vor.u32 %v2809_v2, %v2530_v0  ;;  %v2807_v7 = vld [vmem:[#allocation3 + $0xec] sm:$0xf]  ;;  %v2482_v0 = vld [vmem:[#allocation3 + $0x88] sm:$0xf] }
 0x138   : > { %v2944_v14 = vpop.eup %2943  ;;  %v883_v28 = vadd.f32 1.0, %v2942_v16  ;;  %v2527_v3 = vor.u32 %v2806_v61, %v2524_v63  ;;  %1447 = vmatpush.bf16.msrb.mxu0 %v2523_v62  ;;  %v2476_v63 = vld [vmem:[#allocation3 + $0x90] sm:$0xf0]  ;;  %v2797_v2 = vld [vmem:[#allocation3 + $0x94] sm:$0xf0] }
 0x139   : > { %v3514_v8 = vadd.f32 %v910_v25, %v908_v23  ;;  %v893_v31 = vadd.f32 1.0, %v2944_v14  ;;  %v2946_v35 = vpop.eup %2945  ;;  %v2532_v25 = vld [vmem:[#allocation3 + $0xf8] sm:$0xf0]  ;;  %1475 = vmatpush.bf16.msrb.mxu2 %v2531_v4  ;;  %v2506_v23 = vld [vmem:[#allocation3 + $0xc0] sm:$0xf] }
 0x13a   : > { %2951 = vrcp.f32 %v883_v28  ;;  %v2948_v36 = vpop.eup %2947  ;;  %v904_v39 = vadd.f32 1.0, %v2946_v35  ;;  %v2535_v16 = vor.u32 %v2807_v7, %v2532_v25  ;;  %1461 = vmatpush.bf16.msrb.mxu1 %v2527_v3  ;;  %v2804_v14 = vld [vmem:[#allocation3 + $0xcc] sm:$0xf0]  ;;  %v2802_v28 = vld [vmem:[#allocation3 + $0xc4] sm:$0xf]  ;;  %v2479_v7 = vor.u32 %v2794_v59, %v2476_v63 }
 0x13b   : > { %2953 = vrcp.f32 %v893_v31  ;;  %v2507_v31 = vor.u32 %v2804_v14, %v2506_v23  ;;  %v2508_v35 = vld [vmem:[#allocation3 + $0xd0] sm:$0xf0]  ;;  %v2483_v25 = vor.u32 %v2797_v2, %v2482_v0  ;;  %v2484_v23 = vld [vmem:[#allocation3 + $0x98] sm:$0xf0]  ;;  %v2450_v59 = vld [vmem:[#allocation3 + $0x48] sm:$0xf] }
 0x13c   : > { %2955 = vtanh.f32 %v3514_v8  ;;  %1489 = vmatpush.bf16.msrb.mxu3 %v2535_v16  ;;  %v2795_v16 = vld [vmem:[#allocation3 + $0x8c] sm:$0xf] }
 0x13d   : > { %v2950_v11 = vpop.eup %2949  ;;  %2957 = vrcp.f32 %v904_v39  ;;  %v2511_v39 = vor.u32 %v2802_v28, %v2508_v35  ;;  %1448 = vmatpush.bf16.msrb.mxu0 %v2507_v31  ;;  %v2487_v14 = vor.u32 %v2795_v16, %v2484_v23  ;;  %v2458_v35 = vld [vmem:[#allocation3 + $0x60] sm:$0xf]  ;;  %v2787_v2 = vld [vmem:[#allocation3 + $0x4c] sm:$0xf] }
 0x13e   : > { %v905_v41 = vadd.f32 1.0, %v2950_v11  ;;  %v2805_v11 = vld [vmem:[#allocation3 + $0xd4] sm:$0xf0]  ;;  %v2426_v23 = vld [vmem:[#allocation3 + $0x20] sm:$0xf] }
 0x13f   : > { %1462 = vmatpush.bf16.msrb.mxu1 %v2511_v39  ;;  %v2790_v39 = vld [vmem:[#allocation3 + $0x64] sm:$0xf] }
 0x140   : > { %v2952_v12 = vpop.eup %2951  ;;  %2959 = vrcp.f32 %v905_v41  ;;  %v2490_v41 = vld [vmem:[#allocation3 + $0xa0] sm:$0xf] }
 0x141   : > { %v911_v1 = vmul.f32 %v2952_v12, %v2948_v36  ;;  %v2954_v9 = vpop.eup %2953  ;;  %v2514_v36 = vld [vmem:[#allocation3 + $0xc8] sm:$0xf] }
 0x142   : > { %v909_v43 = vmul.f32 %v2954_v9, %v610_v15  ;;  %v2956_v47 = vpop.eup %2955  ;;  %v2515_v12 = vor.u32 %v2805_v11, %v2514_v36  ;;  %v2803_v15 = vld [vmem:[#allocation3 + $0xcc] sm:$0xf]  ;;  %v2792_v36 = vld [vmem:[#allocation3 + $0x6c] sm:$0xf0] }
 0x143   : > { %v2958_v51 = vpop.eup %2957  ;;  %v2459_v11 = vor.u32 %v2792_v36, %v2458_v35 }
 0x144   : > { %v3517_v44 = vadd.f32 %v911_v1, %v909_v43  ;;  %v916_v18 = vmul.f32 %v2958_v51, %v2956_v47  ;;  %v2516_v1 = vld [vmem:[#allocation3 + $0xd8] sm:$0xf0]  ;;  %1476 = vmatpush.bf16.msrb.mxu2 %v2515_v12  ;;  %v2800_v43 = vld [vmem:[#allocation3 + $0xac] sm:$0xf0]  ;;  %v2798_v47 = vld [vmem:[#allocation3 + $0xa4] sm:$0xf] }
 0x145   : > { %v2519_v9 = vor.u32 %v2803_v15, %v2516_v1  ;;  %v2491_v51 = vor.u32 %v2800_v43, %v2490_v41  ;;  %v2460_v12 = vld [vmem:[#allocation3 + $0x70] sm:$0xf0]  ;;  %v2466_v15 = vld [vmem:[#allocation3 + $0x68] sm:$0xf]  ;;  %v2791_v43 = vld [vmem:[#allocation3 + $0x6c] sm:$0xf] }
 0x146   : > { %2961 = vtanh.f32 %v3517_v44  ;;  %v2960_v24 = vpop.eup %2959  ;;  %v918_v52 = vpack.c.bf16 %v916_v18, %v916_v18 }
 0x147   : > { %1490 = vmatpush.bf16.msrb.mxu3 %v2519_v9  ;;  %1449 = vmatpush.bf16.msrb.mxu0 %v2491_v51  ;;  %v2793_v9 = vld [vmem:[#allocation3 + $0x74] sm:$0xf0] }
 0x148   : > { %v965_v55 = vunpack.c.l.b16 %v918_v52  ;;  %v2467_v41 = vor.u32 %v2793_v9, %v2466_v15 }
 0x14c   : > { %v2962_v49 = vpop.eup %2961 }
 0x14d   : > { %v917_v10 = vmul.f32 %v2962_v49, %v2960_v24  ;;  %v2498_v24 = vld [vmem:[#allocation3 + $0xa8] sm:$0xf]  ;;  %v2801_v49 = vld [vmem:[#allocation3 + $0xb4] sm:$0xf0] }
 0x14e   : > { %v2499_v52 = vor.u32 %v2801_v49, %v2498_v24  ;;  %v2442_v49 = vld [vmem:[#allocation3 + $0x40] sm:$0xf] }
 0x14f   : > { %v2847_v13 = vpack.c.bf16 %v917_v10, %v916_v18  ;;  %v919_v17 = vpack.c.bf16 %v917_v10, %v917_v10  ;;  %v2492_v18 = vld [vmem:[#allocation3 + $0xb0] sm:$0xf0] }
 0x150   : > { %v2495_v10 = vor.u32 %v2798_v47, %v2492_v18  ;;  %1477 = vmatpush.bf16.msrb.mxu2 %v2499_v52  ;;  %v2468_v47 = vld [vmem:[#allocation3 + $0x78] sm:$0xf0]  ;;  %v2786_v52 = vld [vmem:[#allocation3 + $0x44] sm:$0xf] }
 0x151   : > { %2848 = vst [vmem:[%s3388_s29] sm:$0xff] %v2847_v13   ;;  %v966_v57 = vunpack.c.l.b16 %v919_v17  ;;  %v2799_v13 = vld [vmem:[#allocation3 + $0xac] sm:$0xf]  ;;  %v2500_v17 = vld [vmem:[#allocation3 + $0xb8] sm:$0xf0]  ;;  %v2471_v24 = vor.u32 %v2791_v43, %v2468_v47 }
 0x152   : > { %1463 = vmatpush.bf16.msrb.mxu1 %v2495_v10  ;;  %v2788_v10 = vld [vmem:[#allocation3 + $0x4c] sm:$0xf0]  ;;  %v2436_v47 = vld [vmem:[#allocation3 + $0x38] sm:$0xf0] }
 0x153   : > { %v967_v58 = vpack.c.b16 %v966_v57, %v965_v55  ;;  %v2503_v55 = vor.u32 %v2799_v13, %v2500_v17  ;;  %v2474_v57 = vld [vmem:[#allocation3 + $0x80] sm:$0xf] }
 0x154   : > { %1478 = vmatpush.bf16.msrb.mxu2 %v2483_v25 }
 0x155   : > { %1137 = vmatmul.bf16.vlgmr.msra.gmra.mxu0 %v967_v58  ;;  %1151 = vmatmul.bf16.vlgmr.msra.gmra.mxu1 %v967_v58 }
 0x156   : > { %1165 = vmatmul.bf16.vlgmr.msra.gmra.mxu2 %v967_v58  ;;  %1179 = vmatmul.bf16.vlgmr.msra.gmra.mxu3 %v967_v58  ;;  %v2796_v58 = vld [vmem:[#allocation3 + $0x8c] sm:$0xf0] }
 0x157   : > { %1491 = vmatpush.bf16.msrb.mxu3 %v2503_v55  ;;  %v2475_v62 = vor.u32 %v2796_v58, %v2474_v57  ;;  %1464 = vmatpush.bf16.msrb.mxu1 %v2479_v7  ;;  %v2443_v57 = vor.u32 %v2788_v10, %v2442_v49  ;;  %v2444_v58 = vld [vmem:[#allocation3 + $0x50] sm:$0xf0]  ;;  %v2780_v49 = vld [vmem:[#allocation3 + $0xc] sm:$0xf0]  ;;  %v2778_v10 = vld [vmem:[#allocation3 + $0x4] sm:$0xf] }
 0x158   : > { %1479 = vmatpush.bf16.msrb.mxu2 %v2467_v41  ;;  %v2447_v63 = vor.u32 %v2786_v52, %v2444_v58  ;;  %v2412_v52 = vld [vmem:[#allocation3 + $0x10] sm:$0xf0]  ;;  %v2779_v58 = vld [vmem:[#allocation3 + $0xc] sm:$0xf] }
 0x159   : > { %1450 = vmatpush.bf16.msrb.mxu0 %v2475_v62 }
 0x15b   : > { %1492 = vmatpush.bf16.msrb.mxu3 %v2487_v14  ;;  %v2784_v14 = vld [vmem:[#allocation3 + $0x2c] sm:$0xf0] }
 0x15d   : > { %1451 = vmatpush.bf16.msrb.mxu0 %v2459_v11 }
 0x15f   : > { %1493 = vmatpush.bf16.msrb.mxu3 %v2471_v24 }
 0x161   : > { %1452 = vmatpush.bf16.msrb.mxu0 %v2443_v57  ;;  %v2781_v57 = vld [vmem:[#allocation3 + $0x14] sm:$0xf0] }
 0x1d2   : > { %v1138_v60 = vpop.f32.mrf.mxu0  ;;  %v1152_v61 = vpop.f32.mrf.mxu1 }
 0x1d3   : > { %v1185_v3 = vadd.f32 %v1138_v60, %v3423_v20  ;;  %v1186_v4 = vadd.f32 %v1152_v61, %v3426_v22  ;;  %v2463_v22 = vor.u32 %v2790_v39, %v2460_v12  ;;  %v2789_v60 = vld [vmem:[#allocation3 + $0x54] sm:$0xf0]  ;;  %v2434_v12 = vld [vmem:[#allocation3 + $0x28] sm:$0xf] }
 0x1d4   : > { %v2451_v0 = vor.u32 %v2789_v60, %v2450_v59 }
 0x1d5   : > { %v1193_v28 = vsub.f32 0.0, %v1185_v3  ;;  %v1203_v31 = vsub.f32 0.0, %v1186_v4  ;;  %1465 = vmatpush.bf16.msrb.mxu1 %v2463_v22  ;;  %v2452_v3 = vld [vmem:[#allocation3 + $0x58] sm:$0xf0] }
 0x1d6   : > { %1480 = vmatpush.bf16.msrb.mxu2 %v2451_v0 }
 0x1d7   : > { %v1195_v20 = vmul.f32 1.442695, %v1193_v28  ;;  %v1205_v1 = vmul.f32 1.442695, %v1203_v31  ;;  %v2782_v31 = vld [vmem:[#allocation3 + $0x24] sm:$0xf] }
 0x1d9   : > { %2963 = vpow2.f32 %v1195_v20  ;;  %v1166_v51 = vpop.f32.mrf.mxu2  ;;  %v1180_v18 = vpop.f32.mrf.mxu3  ;;  %1466 = vmatpush.bf16.msrb.mxu1 %v2447_v63  ;;  %v2785_v20 = vld [vmem:[#allocation3 + $0x34] sm:$0xf0] }
 0x1da   : > { %2965 = vpow2.f32 %v1205_v1  ;;  %v1188_v13 = vadd.f32 %v1180_v18, %v3436_v29  ;;  %v1140_v17 = vpop.f32.mrf.mxu0  ;;  %v1154_v55 = vpop.f32.mrf.mxu1  ;;  %v1187_v4 = vadd.f32 %v1166_v51, %v3433_v26  ;;  %v2455_v29 = vor.u32 %v2787_v2, %v2452_v3  ;;  %v2783_v1 = vld [vmem:[#allocation3 + $0x2c] sm:$0xf]  ;;  %v2410_v51 = vld [vmem:[#allocation3] sm:$0xf] }
 0x1db   : > { %v1189_v61 = vadd.f32 %v1140_v17, %v3439_v30  ;;  %v1190_v62 = vadd.f32 %v1154_v55, %v3442_v32  ;;  %v2427_v30 = vor.u32 %v2784_v14, %v2426_v23  ;;  %v2428_v32 = vld [vmem:[#allocation3 + $0x30] sm:$0xf0]  ;;  %v2435_v43 = vor.u32 %v2785_v20, %v2434_v12  ;;  %v2418_v55 = vld [vmem:[#allocation3 + $0x8] sm:$0xf] }
 0x1dc   : > { %v1215_v7 = vsub.f32 0.0, %v1188_v13  ;;  %1494 = vmatpush.bf16.msrb.mxu3 %v2455_v29  ;;  %v2431_v39 = vor.u32 %v2782_v31, %v2428_v32  ;;  %2967 = vtanh.f32 %v1187_v4  ;;  %v2439_v24 = vor.u32 %v2783_v1, %v2436_v47 }
 0x1dd   : > { %v1194_v25 = vsub.f32 0.0, %v1189_v61  ;;  %v1204_v16 = vsub.f32 0.0, %v1190_v62  ;;  %1453 = vmatpush.bf16.msrb.mxu0 %v2427_v30  ;;  %1481 = vmatpush.bf16.msrb.mxu2 %v2435_v43  ;;  %v2411_v13 = vor.u32 %v2780_v49, %v2410_v51  ;;  %v2415_v17 = vor.u32 %v2778_v10, %v2412_v52  ;;  %v2420_v62 = vld [vmem:[#allocation3 + $0x18] sm:$0xf0]  ;;  %v2838_v49 = vld [vmem:[#allocation3 + $0xe4] sm:$0xf] }
 0x1de   : > { %v1217_v28 = vmul.f32 1.442695, %v1215_v7  ;;  %1467 = vmatpush.bf16.msrb.mxu1 %v2431_v39  ;;  %v2419_v61 = vor.u32 %v2781_v57, %v2418_v55  ;;  %v2654_v52 = vld [vmem:[#allocation3 + $0xf0] sm:$0xf0] }
 0x1df   : > { %v2964_v35 = vpop.eup %2963  ;;  %v1197_v36 = vmul.f32 1.442695, %v1194_v25  ;;  %v1207_v11 = vmul.f32 1.442695, %v1204_v16  ;;  %v2657_v55 = vor.u32 %v2838_v49, %v2654_v52  ;;  %v2614_v52 = vld [vmem:[#allocation3 + $0x98] sm:$0xf0] }
 0x1e0   : > { %v2966_v26 = vpop.eup %2965  ;;  %v1199_v15 = vadd.f32 1.0, %v2964_v35  ;;  %1495 = vmatpush.bf16.msrb.mxu3 %v2439_v24  ;;  %v2840_v24 = vld [vmem:[#allocation3 + $0xec] sm:$0xf0] }
 0x1e1   : > { %v1209_v22 = vadd.f32 1.0, %v2966_v26  ;;  %2969 = vpow2.f32 %v1197_v36  ;;  %v1168_v9 = vpop.f32.mrf.mxu2  ;;  %v1182_v41 = vpop.f32.mrf.mxu3  ;;  %1454 = vmatpush.bf16.msrb.mxu0 %v2411_v13  ;;  %1482 = vmatpush.bf16.msrb.mxu2 %v2419_v61  ;;  %v2660_v13 = vld [vmem:[#allocation3 + $0xe8] sm:$0xf]  ;;  %v2636_v61 = vld [vmem:[#allocation3 + $0xc0] sm:$0xf] }
 0x1e2   : > { %2971 = vrcp.f32 %v1199_v15  ;;  %v1192_v18 = vadd.f32 %v1182_v41, %v3448_v37  ;;  %v1191_v59 = vadd.f32 %v1168_v9, %v3445_v34  ;;  %1468 = vmatpush.bf16.msrb.mxu1 %v2415_v17  ;;  %v2423_v37 = vor.u32 %v2779_v58, %v2420_v62  ;;  %v2968_v63 = vpop.eup %2967  ;;  %v2841_v17 = vld [vmem:[#allocation3 + $0xf4] sm:$0xf0]  ;;  %v2839_v58 = vld [vmem:[#allocation3 + $0xec] sm:$0xf]  ;;  %v2836_v62 = vld [vmem:[#allocation3 + $0xcc] sm:$0xf0] }
 0x1e3   : > { %2973 = vrcp.f32 %v1209_v22  ;;  %v2661_v57 = vor.u32 %v2841_v17, %v2660_v13 }
 0x1e4   : > { %2975 = vpow2.f32 %v1207_v11  ;;  %v1216_v60 = vsub.f32 0.0, %v1192_v18  ;;  %1496 = vmatpush.bf16.msrb.mxu3 %v2423_v37  ;;  %v2834_v37 = vld [vmem:[#allocation3 + $0xc4] sm:$0xf] }
 0x1e5   : > { %2977 = vpow2.f32 %v1217_v28  ;;  %1793 = vmatpush.bf16.msra.mxu2 %v2661_v57  ;;  %v2588_v57 = vld [vmem:[#allocation3 + $0x60] sm:$0xf] }
 0x1e6   : > { %v1219_v0 = vmul.f32 1.442695, %v1216_v60  ;;  %2979 = vtanh.f32 %v1191_v59  ;;  %v2662_v59 = vld [vmem:[#allocation3 + $0xf8] sm:$0xf0]  ;;  %1779 = vmatpush.bf16.msra.mxu1 %v2657_v55 }
 0x1e7   : > { %v2970_v2 = vpop.eup %2969  ;;  %v2665_v60 = vor.u32 %v2839_v58, %v2662_v59  ;;  %v2824_v58 = vld [vmem:[#allocation3 + $0x6c] sm:$0xf0] }
 0x1e8   : > { %v2972_v3 = vpop.eup %2971  ;;  %v1200_v4 = vadd.f32 1.0, %v2970_v2  ;;  %2981 = vpow2.f32 %v1219_v0  ;;  %v2638_v0 = vld [vmem:[#allocation3 + $0xd0] sm:$0xf0]  ;;  %v2644_v2 = vld [vmem:[#allocation3 + $0xc8] sm:$0xf]  ;;  %v2589_v59 = vor.u32 %v2824_v58, %v2588_v57 }
 0x1e9   : > { %v2974_v7 = vpop.eup %2973  ;;  %v1227_v29 = vmul.f32 %v2972_v3, %v2968_v63  ;;  %1807 = vmatpush.bf16.msra.mxu3 %v2665_v60  ;;  %v2637_v63 = vor.u32 %v2836_v62, %v2636_v61  ;;  %v2837_v3 = vld [vmem:[#allocation3 + $0xd4] sm:$0xf0]  ;;  %v2822_v60 = vld [vmem:[#allocation3 + $0x64] sm:$0xf]  ;;  %v2590_v61 = vld [vmem:[#allocation3 + $0x70] sm:$0xf0] }
 0x1ea   : > { %v2976_v34 = vpop.eup %2975  ;;  %v1225_v25 = vmul.f32 %v2974_v7, %v3514_v8  ;;  %2983 = vrcp.f32 %v1200_v4  ;;  %v2641_v4 = vor.u32 %v2834_v37, %v2638_v0  ;;  %v2645_v7 = vor.u32 %v2837_v3, %v2644_v2  ;;  %v2596_v62 = vld [vmem:[#allocation3 + $0x68] sm:$0xf]  ;;  %v2823_v2 = vld [vmem:[#allocation3 + $0x6c] sm:$0xf]  ;;  %v2598_v3 = vld [vmem:[#allocation3 + $0x78] sm:$0xf0] }
 0x1eb   : > { %v1210_v16 = vadd.f32 1.0, %v2976_v34  ;;  %v2978_v14 = vpop.eup %2977  ;;  %v2646_v34 = vld [vmem:[#allocation3 + $0xd8] sm:$0xf0] }
 0x1ec   : > { %v3530_v23 = vadd.f32 %v1227_v29, %v1225_v25  ;;  %v2980_v30 = vpop.eup %2979  ;;  %v1221_v32 = vadd.f32 1.0, %v2978_v14  ;;  %v2835_v29 = vld [vmem:[#allocation3 + $0xcc] sm:$0xf]  ;;  %1780 = vmatpush.bf16.msra.mxu1 %v2641_v4  ;;  %1794 = vmatpush.bf16.msra.mxu2 %v2645_v7  ;;  %v2832_v14 = vld [vmem:[#allocation3 + $0xac] sm:$0xf0] }
 0x1ed   : > { %2985 = vrcp.f32 %v1210_v16  ;;  %v2649_v25 = vor.u32 %v2835_v29, %v2646_v34  ;;  %v2620_v16 = vld [vmem:[#allocation3 + $0xa0] sm:$0xf]  ;;  %v2601_v29 = vor.u32 %v2823_v2, %v2598_v3 }
 0x1ee   : > { %v2982_v31 = vpop.eup %2981  ;;  %2987 = vtanh.f32 %v3530_v23  ;;  %v2572_v34 = vld [vmem:[#allocation3 + $0x40] sm:$0xf] }
 0x1ef   : > { %v1222_v11 = vadd.f32 1.0, %v2982_v31  ;;  %2989 = vrcp.f32 %v1221_v32  ;;  %1808 = vmatpush.bf16.msra.mxu3 %v2649_v25  ;;  %v2621_v31 = vor.u32 %v2832_v14, %v2620_v16  ;;  %v2628_v32 = vld [vmem:[#allocation3 + $0xa8] sm:$0xf]  ;;  %v2820_v25 = vld [vmem:[#allocation3 + $0x4c] sm:$0xf0] }
 0x1f0   : > { %v2984_v28 = vpop.eup %2983  ;;  %v2818_v16 = vld [vmem:[#allocation3 + $0x44] sm:$0xf] }
 0x1f1   : > { %v1228_v35 = vmul.f32 %v2984_v28, %v2980_v30  ;;  %2991 = vrcp.f32 %v1222_v11  ;;  %v2830_v30 = vld [vmem:[#allocation3 + $0xa4] sm:$0xf]  ;;  %v2622_v28 = vld [vmem:[#allocation3 + $0xb0] sm:$0xf0] }
 0x1f3   : > { %v2986_v36 = vpop.eup %2985 }
 0x1f4   : > { %v1226_v39 = vmul.f32 %v2986_v36, %v3517_v44  ;;  %v2988_v12 = vpop.eup %2987  ;;  %v2652_v44 = vld [vmem:[#allocation3 + $0xe0] sm:$0xf]  ;;  %v2625_v36 = vor.u32 %v2830_v30, %v2622_v28  ;;  %v2573_v28 = vor.u32 %v2820_v25, %v2572_v34 }
 0x1f5   : > { %v2990_v26 = vpop.eup %2989  ;;  %v2653_v10 = vor.u32 %v2840_v24, %v2652_v44 }
 0x1f6   : > { %v3534_v8 = vadd.f32 %v1228_v35, %v1226_v39  ;;  %v1233_v15 = vmul.f32 %v2990_v26, %v2988_v12  ;;  %v2833_v35 = vld [vmem:[#allocation3 + $0xb4] sm:$0xf0]  ;;  %v2831_v39 = vld [vmem:[#allocation3 + $0xac] sm:$0xf]  ;;  %v2630_v12 = vld [vmem:[#allocation3 + $0xb8] sm:$0xf0]  ;;  %1781 = vmatpush.bf16.msra.mxu1 %v2625_v36 }
 0x1f7   : > { %v2992_v20 = vpop.eup %2991  ;;  %1765 = vmatpush.bf16.msra.mxu0 %v2653_v10  ;;  %v2629_v11 = vor.u32 %v2833_v35, %v2628_v32  ;;  %v2633_v26 = vor.u32 %v2831_v39, %v2630_v12  ;;  %v2827_v10 = vld [vmem:[#allocation3 + $0x8c] sm:$0xf]  ;;  %v2574_v32 = vld [vmem:[#allocation3 + $0x50] sm:$0xf0]  ;;  %v2580_v35 = vld [vmem:[#allocation3 + $0x48] sm:$0xf] }
 0x1f8   : > { %2993 = vtanh.f32 %v3534_v8  ;;  %v1235_v9 = vpack.c.bf16 %v1233_v15, %v1233_v15  ;;  %v2617_v13 = vor.u32 %v2827_v10, %v2614_v52  ;;  %v2821_v36 = vld [vmem:[#allocation3 + $0x54] sm:$0xf0]  ;;  %v2577_v12 = vor.u32 %v2818_v16, %v2574_v32  ;;  %v2564_v52 = vld [vmem:[#allocation3 + $0x28] sm:$0xf] }
 0x1f9   : > { %1795 = vmatpush.bf16.msra.mxu2 %v2629_v11  ;;  %1809 = vmatpush.bf16.msra.mxu3 %v2633_v26  ;;  %v2581_v26 = vor.u32 %v2821_v36, %v2580_v35 }
 0x1fa   : > { %v1283_v47 = vunpack.c.l.b16 %v1235_v9 }
 0x1fb   : > { %1766 = vmatpush.bf16.msra.mxu0 %v2637_v63  ;;  %v2825_v63 = vld [vmem:[#allocation3 + $0x74] sm:$0xf0] }
 0x1fc   : > { %v2597_v0 = vor.u32 %v2825_v63, %v2596_v62  ;;  %v2540_v62 = vld [vmem:[#allocation3] sm:$0xf]  ;;  %v2810_v63 = vld [vmem:[#allocation3 + $0x4] sm:$0xf] }
 0x1fd   : > { %1810 = vmatpush.bf16.msra.mxu3 %v2617_v13 }
 0x1fe   : > { %v2994_v1 = vpop.eup %2993 }
 0x1ff   : > { %v1234_v22 = vmul.f32 %v2994_v1, %v2992_v20  ;;  %1767 = vmatpush.bf16.msra.mxu0 %v2621_v31  ;;  %v2828_v20 = vld [vmem:[#allocation3 + $0x8c] sm:$0xf0]  ;;  %v2826_v1 = vld [vmem:[#allocation3 + $0x84] sm:$0xf] }
 0x201   : > { %v2852_v41 = vpack.c.bf16 %v1234_v22, %v1233_v15  ;;  %v1236_v43 = vpack.c.bf16 %v1234_v22, %v1234_v22  ;;  %v2604_v15 = vld [vmem:[#allocation3 + $0x80] sm:$0xf]  ;;  %1811 = vmatpush.bf16.msra.mxu3 %v2601_v29  ;;  %v2811_v29 = vld [vmem:[#allocation3 + $0xc] sm:$0xf] }
 0x203   : > { %2864 = vst [vmem:[%s3388_s29 + $0x8] sm:$0xff] %v2852_v41   ;;  %v1284_v51 = vunpack.c.l.b16 %v1236_v43  ;;  %v2605_v41 = vor.u32 %v2828_v20, %v2604_v15  ;;  %v2606_v43 = vld [vmem:[#allocation3 + $0x90] sm:$0xf0]  ;;  %v2819_v15 = vld [vmem:[#allocation3 + $0x4c] sm:$0xf] }
 0x204   : > { %v2609_v24 = vor.u32 %v2826_v1, %v2606_v43  ;;  %v2582_v20 = vld [vmem:[#allocation3 + $0x58] sm:$0xf0]  ;;  %v2556_v43 = vld [vmem:[#allocation3 + $0x20] sm:$0xf] }
 0x205   : > { %v1285_v18 = vpack.c.b16 %v1284_v51, %v1283_v47  ;;  %v2612_v47 = vld [vmem:[#allocation3 + $0x88] sm:$0xf]  ;;  %v2829_v51 = vld [vmem:[#allocation3 + $0x94] sm:$0xf0]  ;;  %1768 = vmatpush.bf16.msra.mxu0 %v2605_v41 }
 0x206   : > { %v2613_v49 = vor.u32 %v2829_v51, %v2612_v47  ;;  %1782 = vmatpush.bf16.msra.mxu1 %v2609_v24  ;;  %v2816_v47 = vld [vmem:[#allocation3 + $0x2c] sm:$0xf0] }
 0x207   : > { %1455 = vmatmul.bf16.vlgmr.msrb.gmra.mxu0 %v1285_v18  ;;  %1469 = vmatmul.bf16.vlgmr.msrb.gmra.mxu1 %v1285_v18 }
 0x208   : > { %1483 = vmatmul.bf16.vlgmr.msrb.gmra.mxu2 %v1285_v18  ;;  %1497 = vmatmul.bf16.vlgmr.msrb.gmra.mxu3 %v1285_v18 }
 0x209   : > { %1796 = vmatpush.bf16.msra.mxu2 %v2613_v49  ;;  %1769 = vmatpush.bf16.msra.mxu0 %v2589_v59 }
 0x20d   : > { %1797 = vmatpush.bf16.msra.mxu2 %v2597_v0  ;;  %1770 = vmatpush.bf16.msra.mxu0 %v2573_v28  ;;  %v2542_v0 = vld [vmem:[#allocation3 + $0x10] sm:$0xf0] }
 0x20e   : > { %v2545_v3 = vor.u32 %v2810_v63, %v2542_v0 }
 0x211   : > { %1798 = vmatpush.bf16.msra.mxu2 %v2581_v26 }
 0x284   : > { %v1456_v22 = vpop.f32.mrf.mxu0  ;;  %v1470_v9 = vpop.f32.mrf.mxu1 }
 0x285   : > { %v1503_v18 = vadd.f32 %v1456_v22, %v3451_v38  ;;  %v1504_v44 = vadd.f32 %v1470_v9, %v3454_v40  ;;  %v2593_v40 = vor.u32 %v2822_v60, %v2590_v61  ;;  %v2566_v61 = vld [vmem:[#allocation3 + $0x38] sm:$0xf0] }
 0x287   : > { %v1511_v17 = vsub.f32 0.0, %v1503_v18  ;;  %v1521_v55 = vsub.f32 0.0, %v1504_v44  ;;  %1783 = vmatpush.bf16.msra.mxu1 %v2593_v40  ;;  %v2814_v18 = vld [vmem:[#allocation3 + $0x24] sm:$0xf]  ;;  %v2812_v40 = vld [vmem:[#allocation3 + $0xc] sm:$0xf0] }
 0x288   : > { %v2541_v2 = vor.u32 %v2812_v40, %v2540_v62 }
 0x289   : > { %v1513_v38 = vmul.f32 1.442695, %v1511_v17  ;;  %v1523_v37 = vmul.f32 1.442695, %v1521_v55  ;;  %v2817_v17 = vld [vmem:[#allocation3 + $0x34] sm:$0xf0] }
 0x28a   : > { %v2815_v55 = vld [vmem:[#allocation3 + $0x2c] sm:$0xf]  ;;  %v2565_v60 = vor.u32 %v2817_v17, %v2564_v52 }
 0x28b   : > { %2995 = vpow2.f32 %v1513_v38  ;;  %v1484_v4 = vpop.f32.mrf.mxu2  ;;  %v1498_v7 = vpop.f32.mrf.mxu3  ;;  %1784 = vmatpush.bf16.msra.mxu1 %v2577_v12 }
 0x28c   : > { %2997 = vpow2.f32 %v1523_v37  ;;  %v1506_v14 = vadd.f32 %v1498_v7, %v3460_v45  ;;  %v1458_v30 = vpop.f32.mrf.mxu0  ;;  %v1472_v31 = vpop.f32.mrf.mxu1  ;;  %v1505_v1 = vadd.f32 %v1484_v4, %v3457_v42  ;;  %v2585_v45 = vor.u32 %v2819_v15, %v2582_v20  ;;  %1799 = vmatpush.bf16.msra.mxu2 %v2565_v60  ;;  %v2548_v4 = vld [vmem:[#allocation3 + $0x8] sm:$0xf]  ;;  %v2813_v7 = vld [vmem:[#allocation3 + $0x14] sm:$0xf0] }
 0x28d   : > { %v1507_v11 = vadd.f32 %v1458_v30, %v3463_v46  ;;  %v1508_v39 = vadd.f32 %v1472_v31, %v3466_v48  ;;  %v2557_v46 = vor.u32 %v2816_v47, %v2556_v43  ;;  %v2558_v48 = vld [vmem:[#allocation3 + $0x30] sm:$0xf0]  ;;  %v2569_v37 = vor.u32 %v2815_v55, %v2566_v61 }
 0x28e   : > { %v1533_v22 = vsub.f32 0.0, %v1506_v14  ;;  %1812 = vmatpush.bf16.msra.mxu3 %v2585_v45  ;;  %v2561_v10 = vor.u32 %v2814_v18, %v2558_v48  ;;  %2999 = vtanh.f32 %v1505_v1  ;;  %v2549_v16 = vor.u32 %v2813_v7, %v2548_v4  ;;  %v2550_v14 = vld [vmem:[#allocation3 + $0x18] sm:$0xf0] }
 0x28f   : > { %v1512_v9 = vsub.f32 0.0, %v1507_v11  ;;  %v1522_v41 = vsub.f32 0.0, %v1508_v39  ;;  %1771 = vmatpush.bf16.msra.mxu0 %v2557_v46 }
 0x290   : > { %v1535_v51 = vmul.f32 1.442695, %v1533_v22  ;;  %1785 = vmatpush.bf16.msra.mxu1 %v2561_v10  ;;  %1800 = vmatpush.bf16.msra.mxu2 %v2549_v16 }
 0x291   : > { %v2996_v44 = vpop.eup %2995  ;;  %v1515_v24 = vmul.f32 1.442695, %v1512_v9  ;;  %v1525_v49 = vmul.f32 1.442695, %v1522_v41 }
 0x292   : > { %v2998_v42 = vpop.eup %2997  ;;  %v1517_v13 = vadd.f32 1.0, %v2996_v44  ;;  %1813 = vmatpush.bf16.msra.mxu3 %v2569_v37 }
 0x293   : > { %v1527_v57 = vadd.f32 1.0, %v2998_v42  ;;  %3001 = vpow2.f32 %v1515_v24  ;;  %v1486_v58 = vpop.f32.mrf.mxu2  ;;  %v1500_v59 = vpop.f32.mrf.mxu3  ;;  %1772 = vmatpush.bf16.msra.mxu0 %v2541_v2 }
 0x294   : > { %3003 = vrcp.f32 %v1517_v13  ;;  %v1510_v38 = vadd.f32 %v1500_v59, %v3472_v53  ;;  %v1509_v34 = vadd.f32 %v1486_v58, %v3469_v50  ;;  %1786 = vmatpush.bf16.msra.mxu1 %v2545_v3  ;;  %v2553_v53 = vor.u32 %v2811_v29, %v2550_v14  ;;  %v3000_v30 = vpop.eup %2999 }
 0x295   : > { %3005 = vrcp.f32 %v1527_v57 }
 0x296   : > { %3007 = vpow2.f32 %v1525_v49  ;;  %v1534_v25 = vsub.f32 0.0, %v1510_v38  ;;  %1814 = vmatpush.bf16.msra.mxu3 %v2553_v53 }
 0x297   : > { %3009 = vpow2.f32 %v1535_v51 }
 0x298   : > { %v1537_v31 = vmul.f32 1.442695, %v1534_v25  ;;  %3011 = vtanh.f32 %v1509_v34 }
 0x299   : > { %v3002_v28 = vpop.eup %3001 }
 0x29a   : > { %v3004_v32 = vpop.eup %3003  ;;  %v1518_v35 = vadd.f32 1.0, %v3002_v28  ;;  %3013 = vpow2.f32 %v1537_v31 }
 0x29b   : > { %v3006_v36 = vpop.eup %3005  ;;  %v1545_v11 = vmul.f32 %v3004_v32, %v3000_v30 }
 0x29c   : > { %v3008_v50 = vpop.eup %3007  ;;  %v1543_v39 = vmul.f32 %v3006_v36, %v3530_v23  ;;  %3015 = vrcp.f32 %v1518_v35 }
 0x29d   : > { %v1528_v12 = vadd.f32 1.0, %v3008_v50  ;;  %v3010_v15 = vpop.eup %3009 }
 0x29e   : > { %v3547_v26 = vadd.f32 %v1545_v11, %v1543_v39  ;;  %v3012_v20 = vpop.eup %3011  ;;  %v1539_v45 = vadd.f32 1.0, %v3010_v15 }
 0x29f   : > { %3017 = vrcp.f32 %v1528_v12 }
 0x2a0   : > { %v3014_v1 = vpop.eup %3013  ;;  %3019 = vtanh.f32 %v3547_v26 }
 0x2a1   : > { %v1540_v43 = vadd.f32 1.0, %v3014_v1  ;;  %3021 = vrcp.f32 %v1539_v45 }
 0x2a2   : > { %v3016_v22 = vpop.eup %3015 }
 0x2a3   : > { %v1546_v9 = vmul.f32 %v3016_v22, %v3012_v20  ;;  %3023 = vrcp.f32 %v1540_v43 }
 0x2a5   : > { %v3018_v41 = vpop.eup %3017 }
 0x2a6   : > { %v1544_v47 = vmul.f32 %v3018_v41, %v3534_v8  ;;  %v3020_v51 = vpop.eup %3019 }
 0x2a7   : > { %v3022_v46 = vpop.eup %3021 }
 0x2a8   : > { %v3551_v23 = vadd.f32 %v1546_v9, %v1544_v47  ;;  %v1551_v18 = vmul.f32 %v3022_v46, %v3020_v51 }
 0x2a9   : > { %v3024_v48 = vpop.eup %3023 }
 0x2aa   : > { %3025 = vtanh.f32 %v3551_v23  ;;  %v1553_v49 = vpack.c.bf16 %v1551_v18, %v1551_v18 }
 0x2ac   : > { %v1601_v42 = vunpack.c.l.b16 %v1553_v49 }
 0x2b0   : > { %v3026_v44 = vpop.eup %3025 }
 0x2b1   : > { %v1552_v24 = vmul.f32 %v3026_v44, %v3024_v48 }
 0x2b3   : > { %v2857_v10 = vpack.c.bf16 %v1552_v24, %v1551_v18  ;;  %v1554_v52 = vpack.c.bf16 %v1552_v24, %v1552_v24 }
 0x2b5   : > { %2865 = vst [vmem:[%s3388_s29 + $0x10] sm:$0xff] %v2857_v10   ;;  %v1602_v13 = vunpack.c.l.b16 %v1554_v52 }
 0x2b7   : > { %v1603_v17 = vpack.c.b16 %v1602_v13, %v1601_v42 }
 0x2b9   : > { %1773 = vmatmul.bf16.vlgmr.msra.gmra.mxu0 %v1603_v17  ;;  %1787 = vmatmul.bf16.vlgmr.msra.gmra.mxu1 %v1603_v17 }
 0x2ba   : > { %1801 = vmatmul.bf16.vlgmr.msra.gmra.mxu2 %v1603_v17  ;;  %1815 = vmatmul.bf16.vlgmr.msra.gmra.mxu3 %v1603_v17 }
 0x336   : > { %v1774_v8 = vpop.f32.mrf.mxu0  ;;  %v1788_v55 = vpop.f32.mrf.mxu1 }
 0x337   : > { %v1821_v57 = vadd.f32 %v1774_v8, %v3475_v54  ;;  %v1822_v58 = vadd.f32 %v1788_v55, %v3478_v56 }
 0x339   : > { %v1829_v59 = vsub.f32 0.0, %v1821_v57  ;;  %v1839_v60 = vsub.f32 0.0, %v1822_v58 }
 0x33b   : > { %v1831_v61 = vmul.f32 1.442695, %v1829_v59  ;;  %v1841_v62 = vmul.f32 1.442695, %v1839_v60 }
 0x33d   : > { %3027 = vpow2.f32 %v1831_v61  ;;  %v1802_v38 = vpop.f32.mrf.mxu2  ;;  %v1816_v37 = vpop.f32.mrf.mxu3 }
 0x33e   : > { %3029 = vpow2.f32 %v1841_v62  ;;  %v1824_v40 = vadd.f32 %v1816_v37, %v3484_v19  ;;  %v1776_v63 = vpop.f32.mrf.mxu0  ;;  %v1790_v0 = vpop.f32.mrf.mxu1  ;;  %v1823_v2 = vadd.f32 %v1802_v38, %v3481_v5 }
 0x33f   : > { %v1825_v3 = vadd.f32 %v1776_v63, %v3487_v21  ;;  %v1826_v54 = vadd.f32 %v1790_v0, %v3490_v33 }
 0x340   : > { %v1851_v4 = vsub.f32 0.0, %v1824_v40  ;;  %3031 = vtanh.f32 %v1823_v2 }
 0x341   : > { %v1830_v56 = vsub.f32 0.0, %v1825_v3  ;;  %v1840_v7 = vsub.f32 0.0, %v1826_v54 }
 0x342   : > { %v1853_v29 = vmul.f32 1.442695, %v1851_v4 }
 0x343   : > { %v3028_v34 = vpop.eup %3027  ;;  %v1833_v25 = vmul.f32 1.442695, %v1830_v56  ;;  %v1843_v53 = vmul.f32 1.442695, %v1840_v7 }
 0x344   : > { %v3030_v16 = vpop.eup %3029  ;;  %v1835_v14 = vadd.f32 1.0, %v3028_v34  ;;  %3033 = vpow2.f32 %v1853_v29 }
 0x345   : > { %v1845_v19 = vadd.f32 1.0, %v3030_v16  ;;  %3035 = vpow2.f32 %v1833_v25  ;;  %v1804_v30 = vpop.f32.mrf.mxu2  ;;  %v1818_v31 = vpop.f32.mrf.mxu3 }
 0x346   : > { %3037 = vrcp.f32 %v1835_v14  ;;  %v1828_v5 = vadd.f32 %v1818_v31, %v3500_v27  ;;  %v1827_v21 = vadd.f32 %v1804_v30, %v3497_v6  ;;  %v3032_v28 = vpop.eup %3031 }
 0x347   : > { %3039 = vrcp.f32 %v1845_v19 }
 0x348   : > { %3041 = vpow2.f32 %v1843_v53  ;;  %v1852_v33 = vsub.f32 0.0, %v1828_v5 }
 0x349   : > { %3043 = vtanh.f32 %v1827_v21 }
 0x34a   : > { %v3034_v32 = vpop.eup %3033  ;;  %v1855_v35 = vmul.f32 1.442695, %v1852_v33 }
 0x34b   : > { %v3036_v36 = vpop.eup %3035  ;;  %v1857_v50 = vadd.f32 1.0, %v3034_v32 }
 0x34c   : > { %v3038_v11 = vpop.eup %3037  ;;  %v1836_v39 = vadd.f32 1.0, %v3036_v36  ;;  %3045 = vpow2.f32 %v1855_v35 }
 0x34d   : > { %v3040_v12 = vpop.eup %3039  ;;  %v1863_v15 = vmul.f32 %v3038_v11, %v3032_v28 }
 0x34e   : > { %v3042_v20 = vpop.eup %3041  ;;  %v1861_v1 = vmul.f32 %v3040_v12, %v3547_v26  ;;  %3047 = vrcp.f32 %v1836_v39 }
 0x34f   : > { %v1846_v27 = vadd.f32 1.0, %v3042_v20  ;;  %3049 = vrcp.f32 %v1857_v50  ;;  %v3044_v6 = vpop.eup %3043 }
 0x350   : > { %v1865_v22 = vadd.f32 %v1863_v15, %v1861_v1 }
 0x351   : > { %3051 = vrcp.f32 %v1846_v27 }
 0x352   : > { %3053 = vtanh.f32 %v1865_v22  ;;  %1878 = vst [vmem:[#allocation5 + $0x8] sm:$0xff] %v1865_v22  ;;  %v3046_v45 = vpop.eup %3045 }
 0x353   : > { %v1858_v51 = vadd.f32 1.0, %v3046_v45 }
 0x354   : > { %v3048_v9 = vpop.eup %3047 }
 0x355   : > { %v1864_v41 = vmul.f32 %v3048_v9, %v3044_v6  ;;  %v3050_v43 = vpop.eup %3049  ;;  %3055 = vrcp.f32 %v1858_v51 }
 0x357   : > { %v3052_v47 = vpop.eup %3051 }
 0x358   : > { %v3054_v46 = vpop.eup %3053  ;;  %v1862_v18 = vmul.f32 %v3052_v47, %v3551_v23 }
 0x359   : > { %v1869_v26 = vmul.f32 %v3054_v46, %v3050_v43 }
 0x35a   : > { %v1866_v48 = vadd.f32 %v1864_v41, %v1862_v18 }
 0x35b   : > { %1876 = vst [vmem:[#allocation4] sm:$0xff] %v1869_v26  ;;  %v3056_v44 = vpop.eup %3055 }
 0x35c   : > { %3057 = vtanh.f32 %v1866_v48  ;;  %1879 = vst [vmem:[#allocation5] sm:$0xff] %v1866_v48 }
 0x362   : > { %v3058_v24 = vpop.eup %3057 }
 0x363   : > { %v1870_v49 = vmul.f32 %v3058_v24, %v3056_v44 }
 0x365   : > { %v2862_v23 = vpack.c.bf16 %v1870_v49, %v1869_v26  ;;  %1877 = vst [vmem:[#allocation4 + $0x8] sm:$0xff] %v1870_v49 }
 0x367   : > { %2866 = vst [vmem:[%s3388_s29 + $0x18] sm:$0xff] %v2862_v23  }
 0x368   : > { %3194 = shalt.err (!%p3191_p9)
}
 0x369   : > { %s3249_s14 = smov 64   ;;  %s3250_s29 = smov 4  }
 0x36a   : > { %2873 = dma.vmem_to_hbm [thread:$0]  (%p3328_p11), %s1895_s23, 512, %s1897_s3, %s1881_s10, %s3249_s14, %s3249_s14, %s3250_s29  }
 0x36b PF: > { %s1911_s6 = sand.u32 1, %s3229_s15   ;;  %p3614_p10 = scmp.ge.s32.totalorder %s3241_s18, 2 }
 0x36c   : > { %s1912_s8 = scalar_lea.sflag [#allocation10], %s1911_s6 }
 0x36d   : > { %p2884_p0 = pnand %p3614_p10, %p3332_p12 }
 0x36f   : > { %p2885_p3 = pneg %p2884_p0 }
 0x371   : > { %3224 = dma.done.wait (%p2885_p3), %s1912_s8, 512  }
 0x372   : > { %3226 = vsyncadd (%p2885_p3), %s1912_s8, 4294966784  ;;  %p18_p7 = scmp.ge.s32.totalorder %s3301_s21, 4   ;;  %s3615_s15 = smov %s3233_s16 }
 0x373   : > { %s3616_s16 = smov %s3237_s17  ;;  %s3617_s17 = smov %s3313_s24 }
 0x374   : > { %s3618_s18 = smov %s3301_s21  ;;  %20 = sbr.rel (!%p18_p7) target bundleno = 8 (0x8), region = 97 }
 0x379   :  { %1918 = vsyncpa [#allocation9], 1 }
 0x37a   :  { %1920 = vsyncpa [#allocation9 + $0x1], 1 }
 0x37b   :  { %1921 = vsyncpa [#allocation12], 1 }
 0x37c   :  { %1922 = vsyncpa [#allocation10], 1 }
 0x37d   :  { %1924 = vsyncpa [#allocation10 + $0x1], 1 }
 0x37e   :  { %1925 = vsyncmov [#allocation7] }
 0x381   :  { %s1926_s18 = vpop.sfrf %1925 }
 0x382   :  { %p2674_p11 = scmp.ne.s32.totalorder %s1926_s18, 0 }
 0x384   :  { %1930 = shalt.err (%p2674_p11)  }
 0x385   :  { %1932 = vsyncmov [#allocation7 + $0x1] }
 0x388   :  { %s1933_s27 = vpop.sfrf %1932 }
 0x389   :  { %p2675_p12 = scmp.ne.s32.totalorder %s1933_s27, 0 }
 0x38b   :  { %1937 = shalt.err (%p2675_p12)  }

</bundles_post_ra>
